<compile_context>
chip_gen: v5e
topology: v5e:2x2
jax: 0.10.0
libtpu: 0.0.40
codegen_flags: <defaults>
</compile_context>

<pallas_src>
import functools
import math

import numpy as np
import jax
import jax.numpy as jnp
from jax import lax
from jax.experimental import pallas as pl
from jax.experimental.pallas import tpu as pltpu

# D2Q9 velocity set; moment rows: [rho, jx, jy, e, eps, qx, qy, pxx, pxy]
EX = (0, 1, 0, -1, 0, 1, -1, -1, 1)
EY = (0, 0, 1, 0, -1, 1, 1, -1, -1)


def _build_moment_matrix():
    M = np.zeros((9, 9), dtype=np.float64)
    for q in range(9):
        ex, ey = EX[q], EY[q]
        c2 = ex * ex + ey * ey
        M[0, q] = 1.0                                # rho
        M[1, q] = ex                                 # jx
        M[2, q] = ey                                 # jy
        M[3, q] = -4.0 + 3.0 * c2                    # e
        M[4, q] = 4.0 - 10.5 * c2 + 4.5 * c2 * c2    # eps
        M[5, q] = (-5.0 + 3.0 * c2) * ex             # qx
        M[6, q] = (-5.0 + 3.0 * c2) * ey             # qy
        M[7, q] = ex * ex - ey * ey                  # pxx
        M[8, q] = ex * ey                            # pxy
    return M


_M = _build_moment_matrix()
# Gram-Schmidt rows are mutually orthogonal -> exact inverse with clean
# structural zeros (zeros are used to drop whole terms at trace time).
_MINV = _M.T / np.sum(_M * _M, axis=1)
assert np.allclose(_M @ _MINV, np.eye(9), atol=1e-12)

_UNROLL_MAX = 4  # unroll the time loop up to this many iterations


def _choose_row_pack(H, W):
    """Rows-per-lane-group r so that the packed lane width r*W is 128-dense."""
    if W % 128 == 0:
        return 1
    r = 128 // math.gcd(W, 128)
    if 1 < r <= H and H % r == 0:
        return r
    return 1  # fall back to the plain (H, W) layout (correct, just underfilled)


def _make_kernel(*, H, W, r, iterations, tau, gravity):
    gx, gy = float(gravity[0]), float(gravity[1])
    has_gravity = (gx != 0.0) or (gy != 0.0)
    tau = float(tau)
    omega = 1.0 / tau
    one_minus_omega = 1.0 - omega
    R, L = H // r, r * W
    Mi = [[float(v) for v in row] for row in _MINV]

    def kernel(w_ref, f_ref, out_ref):
        f = [f_ref[0, q] for q in range(9)]          # nine packed (R, L) planes
        w = [w_ref[i] for i in range(7)]             # trainable weights (SMEM)

        # ---- hoisted scalar work: fold Minv, omega and the weights into
        # per-population coefficients of the 6 equilibrium fields.
        def fold(const, terms):
            acc = const if const != 0.0 else None
            for c, wv in terms:
                if c == 0.0:
                    continue
                t = c * wv
                acc = t if acc is None else acc + t
            return acc

        coefs = []
        for q in range(9):
            coefs.append((
                fold(omega * Mi[q][0], [(omega * Mi[q][3], w[0]),
                                        (omega * Mi[q][4], w[2])]),   # * rho
                fold(omega * Mi[q][1], [(omega * Mi[q][5], w[4])]),   # * jx
                fold(omega * Mi[q][2], [(omega * Mi[q][6], w[4])]),   # * jy
                fold(0.0, [(omega * Mi[q][3], w[1]),
                           (-omega * Mi[q][4], w[3])]),               # * |j|^2
                fold(0.0, [(omega * Mi[q][7], w[5])]),                # * jx^2-jy^2
                fold(0.0, [(omega * Mi[q][8], w[6])]),                # * jx*jy
            ))

        # ---- hoisted lane masks for periodic streaming in packed layout
        if r > 1:
            lane = lax.broadcasted_iota(jnp.int32, (R, L), 1)
            col = lane % W
            m_x_lo = col == 0                 # fixup lanes for sx = +1
            m_x_hi = col == (W - 1)           # fixup lanes for sx = -1
            m_y_lo = lane < W                 # fixup lanes for sy = +1
            m_y_hi = lane >= (r - 1) * W      # fixup lanes for sy = -1

        def stream(x, sy, sx):
            """Periodic roll by (sy, sx) on the (H, W) torus, packed layout."""
            if r == 1:
                if sy:
                    x = jnp.roll(x, sy, axis=0)
                if sx:
                    x = jnp.roll(x, sx, axis=1)
                return x
            if sx == 1:
                x = jnp.where(m_x_lo, jnp.roll(x, 1 - W, axis=1),
                              jnp.roll(x, 1, axis=1))
            elif sx == -1:
                x = jnp.where(m_x_hi, jnp.roll(x, W - 1, axis=1),
                              jnp.roll(x, -1, axis=1))
            if sy == 1:
                a = jnp.roll(x, W, axis=1)
                x = jnp.where(m_y_lo, jnp.roll(a, 1, axis=0), a)
            elif sy == -1:
                a = jnp.roll(x, -W, axis=1)
                x = jnp.where(m_y_hi, jnp.roll(a, -1, axis=0), a)
            return x

        def moments(fp):
            rho = fp[0]
            for q in range(1, 9):
                rho = rho + fp[q]
            m1 = fp[1] - fp[3] + fp[5] - fp[6] - fp[7] + fp[8]
            m2 = fp[2] - fp[4] + fp[5] + fp[6] - fp[7] - fp[8]
            return rho, m1, m2

        def step(f_in):
            # handle_boundaries():
            # TODO(synk): NoEqLbmGramSchmidt boundary rule is unavailable;
            # periodic boundaries (implicit in the rolls) are used instead.

            # streaming(): f_q(x + e_q) <- f_q(x)  (periodic wrap)
            fs = [stream(f_in[q], EY[q], EX[q]) for q in range(9)]

            # update_macroscopic() + calculate_equilibrium(), divide-free:
            # jx = rho*(m1/rho + tau*gx*rho) == m1 + tau*gx*rho^2 exactly.
            rho, m1, m2 = moments(fs)
            if has_gravity:
                rho2 = rho * rho
                jx = (m1 + (tau * gx) * rho2) if gx != 0.0 else m1
                jy = (m2 + (tau * gy) * rho2) if gy != 0.0 else m2
            else:
                rho2 = None
                jx, jy = m1, m2
            jx2 = jx * jx
            jy2 = jy * jy
            fields = (rho, jx, jy, jx2 + jy2, jx2 - jy2, jx * jy)

            # collision(): single scalar rate => Minv @ M == I, hence
            #   f_new = (1-omega)*f + omega*(Minv @ m_eq)
            # TODO(synk): per-moment relaxation rates from SimulationConfig are
            # unavailable; a single rate omega = 1/tau is used (the identity
            # collapse above is only valid in that case).
            f_new = []
            for q in range(9):
                acc = one_minus_omega * fs[q] if one_minus_omega != 0.0 else None
                for coef, field in zip(coefs[q], fields):
                    if coef is None:
                        continue
                    term = coef * field
                    acc = term if acc is None else acc + term
                f_new.append(acc)
            return f_new, rho, m1, m2, rho2

        if iterations == 0:
            rho_out, jx_out, jy_out = moments(f)
        elif iterations <= _UNROLL_MAX:
            for _ in range(iterations):
                f, rho, m1, m2, rho2 = step(f)
            # calc_densities / calc_jx / calc_jy: reuse the last iteration's
            # conserved / forced moments (omega * tau == 1), no 9-plane sums.
            rho_out = rho
            jx_out = (m1 + (omega * tau * gx) * rho2) if gx != 0.0 else m1
            jy_out = (m2 + (omega * tau * gy) * rho2) if gy != 0.0 else m2
        else:
            # Long simulations: bound live ranges with a fori_loop carry.
            f_stack = jnp.stack(f)

            def body(_, fs_):
                f_new, *_ = step([fs_[q] for q in range(9)])
                return jnp.stack(f_new)

            f_stack = lax.fori_loop(0, iterations, body, f_stack)
            rho_out, jx_out, jy_out = moments([f_stack[q] for q in range(9)])

        out_ref[0, 0] = rho_out
        out_ref[0, 1] = jx_out
        out_ref[0, 2] = jy_out

    return kernel


@functools.partial(jax.jit, static_argnames=("iterations", "tau", "gravity"))
def lbm_gram_schmidt_forward(f_bhwq, weight, *, iterations=1, tau=0.6,
                             gravity=(0.0, 0.0)):
    """Pallas implementation of LBMGramSchmidtLayer.forward (batched path)."""
    B, H, W, Q = f_bhwq.shape
    assert Q == 9, "D2Q9 scheme expects 9 populations in the last axis"

    r = _choose_row_pack(H, W)
    R, L = H // r, r * W

    # (B, H, W, 9) -> (B, 9, H, W) -> lane-dense packed (B, 9, H/r, r*W);
    # the final reshape is a free row-major regrouping.
    f_packed = jnp.transpose(f_bhwq, (0, 3, 1, 2)).astype(jnp.float32)
    f_packed = f_packed.reshape(B, 9, R, L)

    kernel = _make_kernel(H=H, W=W, r=r, iterations=int(iterations),
                          tau=float(tau),
                          gravity=(float(gravity[0]), float(gravity[1])))

    # Explicit VMEM budget: double-buffered in/out blocks + headroom, clamped
    # below v7x's 64 MiB physical VMEM.
    # TODO(synk): for lattices exceeding this budget, add a spatial grid axis
    # with halo handling for the periodic rolls.
    block_bytes = 2 * (9 + 3) * R * L * 4
    vmem_limit = int(min(max(block_bytes + (4 << 20), 32 << 20), 56 << 20))

    out = pl.pallas_call(
        kernel,
        out_shape=jax.ShapeDtypeStruct((B, 3, R, L), jnp.float32),
        grid=(B,),
        in_specs=[
            # 7 trainable weights live in SMEM (read as scalars)
            pl.BlockSpec(memory_space=pltpu.MemorySpace.SMEM),
            # one batch element of packed populations per grid step
            pl.BlockSpec((1, 9, R, L), lambda b: (b, 0, 0, 0)),
        ],
        out_specs=pl.BlockSpec((1, 3, R, L), lambda b: (b, 0, 0, 0)),
        compiler_params=pltpu.CompilerParams(
            dimension_semantics=("parallel",),
            vmem_limit_bytes=vmem_limit),
    )(weight.astype(jnp.float32), f_packed)

    # unpack (B, 3, H/r, r*W) -> (B, 3, H, W) (free reshape)
    return out.reshape(B, 3, H, W)


def _reference_forward(f_bhwq, weight, *, iterations=1, tau=0.6,
                       gravity=(0.0, 0.0)):
    """Pure-jnp reference that mirrors the PyTorch module's op order."""
    M = jnp.asarray(_M, jnp.float32)
    Minv = jnp.asarray(_MINV, jnp.float32)
    gx, gy = gravity
    omega = 1.0 / tau
    hi = jax.lax.Precision.HIGHEST
    f = jnp.transpose(f_bhwq, (0, 3, 1, 2)).astype(jnp.float32)   # (B, 9, H, W)
    w = weight.astype(jnp.float32)
    for _ in range(iterations):
        f = jnp.stack([jnp.roll(jnp.roll(f[:, q], EY[q], axis=1), EX[q], axis=2)
                       for q in range(9)], axis=1)
        m = jnp.einsum('kq,bqhw->bkhw', M, f, precision=hi)
        rho = m[:, 0]
        ux = m[:, 1] / rho + tau * gx * rho
        uy = m[:, 2] / rho + tau * gy * rho
        jx = rho * ux
        jy = rho * uy
        jsq = jx * jx + jy * jy
        m_eq = jnp.stack([rho, jx, jy,
                          w[0] * rho + w[1] * jsq,
                          w[2] * rho - w[3] * jsq,
                          w[4] * jx, w[4] * jy,
                          w[5] * (jx * jx - jy * jy),
                          w[6] * jx * jy], axis=1)
        m_post = m - omega * (m - m_eq)
        f = jnp.einsum('qk,bkhw->bqhw', Minv, m_post, precision=hi)
    ex = jnp.asarray(EX, jnp.float32)
    ey = jnp.asarray(EY, jnp.float32)
    return jnp.stack([f.sum(axis=1),
                      jnp.einsum('q,bqhw->bhw', ex, f, precision=hi),
                      jnp.einsum('q,bqhw->bhw', ey, f, precision=hi)], axis=1)


if __name__ == "__main__":
    key = jax.random.PRNGKey(0)
    B, H, W, Q = 2, 16, 16, 9

    # Positive initial distribution function so densities stay away from zero.
    f0 = jax.random.uniform(key, (B, H, W, Q), dtype=jnp.float32,
                            minval=0.5, maxval=1.5)

    # nn.Parameter(torch.randn(7)) -> shape (7,); deterministically initialised
    # here to the "classical" Gram-Schmidt collision weights.
    weight = jnp.array([-2.0, 3.0, 1.0, -3.0, -1.0, 1.0 / 3.0, 1.0 / 3.0],
                       dtype=jnp.float32)

    out = lbm_gram_schmidt_forward(f0, weight, iterations=2, tau=0.6,
                                   gravity=(0.0, 0.0))
    out = jax.block_until_ready(out)

    assert out.shape == (B, 3, H, W), out.shape
    assert out.dtype == jnp.float32
    assert bool(jnp.all(jnp.isfinite(out)))

    ref = _reference_forward(f0, weight, iterations=2, tau=0.6,
                             gravity=(0.0, 0.0))
    ref = jax.block_until_ready(ref)
    err = float(jnp.max(jnp.abs(out - ref)))
    assert err < 2e-3, f"mismatch vs reference: max abs err = {err}"

    print("KERNEL_OK")
</pallas_src>

<mosaic_0001>
module attributes {stable_mosaic.version = 11 : i64} {
  func.func @kernel(%arg0: i32, %arg1: memref<7xf32, #tpu.memory_space<smem>>, %arg2: memref<1x9x2x128xf32, #tpu.memory_space<vmem>>, %arg3: memref<1x3x2x128xf32, #tpu.memory_space<vmem>>) attributes {dimension_semantics = [#tpu.dimension_semantics<parallel>], iteration_bounds = array<i64: 2>, scalar_prefetch = 0 : i64, scratch_operands = 0 : i64, tpu.core_type = #tpu.core_type<tc>, window_params = [{transform_indices = @transform_0, window_bounds = array<i64: 7>}, {transform_indices = @transform_1, window_bounds = array<i64: 1, 9, 2, 128>}, {transform_indices = @transform_2, window_bounds = array<i64: 1, 3, 2, 128>}]} {
    %c0 = arith.constant 0 : index
    %c0_0 = arith.constant 0 : index
    %c0_1 = arith.constant 0 : index
    %c0_2 = arith.constant 0 : index
    %0 = vector.load %arg2[%c0, %c0_0, %c0_1, %c0_2] : memref<1x9x2x128xf32, #tpu.memory_space<vmem>>, vector<1x1x2x128xf32>
    %1 = vector.shape_cast %0 : vector<1x1x2x128xf32> to vector<2x128xf32>
    %c0_3 = arith.constant 0 : index
    %c1 = arith.constant 1 : index
    %c0_4 = arith.constant 0 : index
    %c0_5 = arith.constant 0 : index
    %2 = vector.load %arg2[%c0_3, %c1, %c0_4, %c0_5] : memref<1x9x2x128xf32, #tpu.memory_space<vmem>>, vector<1x1x2x128xf32>
    %3 = vector.shape_cast %2 : vector<1x1x2x128xf32> to vector<2x128xf32>
    %c0_6 = arith.constant 0 : index
    %c2 = arith.constant 2 : index
    %c0_7 = arith.constant 0 : index
    %c0_8 = arith.constant 0 : index
    %4 = vector.load %arg2[%c0_6, %c2, %c0_7, %c0_8] : memref<1x9x2x128xf32, #tpu.memory_space<vmem>>, vector<1x1x2x128xf32>
    %5 = vector.shape_cast %4 : vector<1x1x2x128xf32> to vector<2x128xf32>
    %c0_9 = arith.constant 0 : index
    %c3 = arith.constant 3 : index
    %c0_10 = arith.constant 0 : index
    %c0_11 = arith.constant 0 : index
    %6 = vector.load %arg2[%c0_9, %c3, %c0_10, %c0_11] : memref<1x9x2x128xf32, #tpu.memory_space<vmem>>, vector<1x1x2x128xf32>
    %7 = vector.shape_cast %6 : vector<1x1x2x128xf32> to vector<2x128xf32>
    %c0_12 = arith.constant 0 : index
    %c4 = arith.constant 4 : index
    %c0_13 = arith.constant 0 : index
    %c0_14 = arith.constant 0 : index
    %8 = vector.load %arg2[%c0_12, %c4, %c0_13, %c0_14] : memref<1x9x2x128xf32, #tpu.memory_space<vmem>>, vector<1x1x2x128xf32>
    %9 = vector.shape_cast %8 : vector<1x1x2x128xf32> to vector<2x128xf32>
    %c0_15 = arith.constant 0 : index
    %c5 = arith.constant 5 : index
    %c0_16 = arith.constant 0 : index
    %c0_17 = arith.constant 0 : index
    %10 = vector.load %arg2[%c0_15, %c5, %c0_16, %c0_17] : memref<1x9x2x128xf32, #tpu.memory_space<vmem>>, vector<1x1x2x128xf32>
    %11 = vector.shape_cast %10 : vector<1x1x2x128xf32> to vector<2x128xf32>
    %c0_18 = arith.constant 0 : index
    %c6 = arith.constant 6 : index
    %c0_19 = arith.constant 0 : index
    %c0_20 = arith.constant 0 : index
    %12 = vector.load %arg2[%c0_18, %c6, %c0_19, %c0_20] : memref<1x9x2x128xf32, #tpu.memory_space<vmem>>, vector<1x1x2x128xf32>
    %13 = vector.shape_cast %12 : vector<1x1x2x128xf32> to vector<2x128xf32>
    %c0_21 = arith.constant 0 : index
    %c7 = arith.constant 7 : index
    %c0_22 = arith.constant 0 : index
    %c0_23 = arith.constant 0 : index
    %14 = vector.load %arg2[%c0_21, %c7, %c0_22, %c0_23] : memref<1x9x2x128xf32, #tpu.memory_space<vmem>>, vector<1x1x2x128xf32>
    %15 = vector.shape_cast %14 : vector<1x1x2x128xf32> to vector<2x128xf32>
    %c0_24 = arith.constant 0 : index
    %c8 = arith.constant 8 : index
    %c0_25 = arith.constant 0 : index
    %c0_26 = arith.constant 0 : index
    %16 = vector.load %arg2[%c0_24, %c8, %c0_25, %c0_26] : memref<1x9x2x128xf32, #tpu.memory_space<vmem>>, vector<1x1x2x128xf32>
    %17 = vector.shape_cast %16 : vector<1x1x2x128xf32> to vector<2x128xf32>
    %c0_27 = arith.constant 0 : index
    %18 = memref.load %arg1[%c0_27] : memref<7xf32, #tpu.memory_space<smem>>
    %c1_28 = arith.constant 1 : index
    %19 = memref.load %arg1[%c1_28] : memref<7xf32, #tpu.memory_space<smem>>
    %c2_29 = arith.constant 2 : index
    %20 = memref.load %arg1[%c2_29] : memref<7xf32, #tpu.memory_space<smem>>
    %c3_30 = arith.constant 3 : index
    %21 = memref.load %arg1[%c3_30] : memref<7xf32, #tpu.memory_space<smem>>
    %c4_31 = arith.constant 4 : index
    %22 = memref.load %arg1[%c4_31] : memref<7xf32, #tpu.memory_space<smem>>
    %c5_32 = arith.constant 5 : index
    %23 = memref.load %arg1[%c5_32] : memref<7xf32, #tpu.memory_space<smem>>
    %c6_33 = arith.constant 6 : index
    %24 = memref.load %arg1[%c6_33] : memref<7xf32, #tpu.memory_space<smem>>
    %cst = arith.constant -0.185185179 : f32
    %25 = arith.mulf %cst, %18 : f32
    %cst_34 = arith.constant 0.185185179 : f32
    %26 = arith.addf %cst_34, %25 : f32
    %cst_35 = arith.constant 0.185185179 : f32
    %27 = arith.mulf %cst_35, %20 : f32
    %28 = arith.addf %26, %27 : f32
    %cst_36 = arith.constant -0.185185179 : f32
    %29 = arith.mulf %cst_36, %19 : f32
    %cst_37 = arith.constant -0.185185179 : f32
    %30 = arith.mulf %cst_37, %21 : f32
    %31 = arith.addf %29, %30 : f32
    %cst_38 = arith.constant -0.0462962948 : f32
    %32 = arith.mulf %cst_38, %18 : f32
    %cst_39 = arith.constant 0.185185179 : f32
    %33 = arith.addf %cst_39, %32 : f32
    %cst_40 = arith.constant -0.0925925895 : f32
    %34 = arith.mulf %cst_40, %20 : f32
    %35 = arith.addf %33, %34 : f32
    %cst_41 = arith.constant -0.277777791 : f32
    %36 = arith.mulf %cst_41, %22 : f32
    %cst_42 = arith.constant 0.277777791 : f32
    %37 = arith.addf %cst_42, %36 : f32
    %cst_43 = arith.constant -0.0462962948 : f32
    %38 = arith.mulf %cst_43, %19 : f32
    %cst_44 = arith.constant 0.0925925895 : f32
    %39 = arith.mulf %cst_44, %21 : f32
    %40 = arith.addf %38, %39 : f32
    %cst_45 = arith.constant 0.416666657 : f32
    %41 = arith.mulf %cst_45, %23 : f32
    %cst_46 = arith.constant -0.0462962948 : f32
    %42 = arith.mulf %cst_46, %18 : f32
    %cst_47 = arith.constant 0.185185179 : f32
    %43 = arith.addf %cst_47, %42 : f32
    %cst_48 = arith.constant -0.0925925895 : f32
    %44 = arith.mulf %cst_48, %20 : f32
    %45 = arith.addf %43, %44 : f32
    %cst_49 = arith.constant -0.277777791 : f32
    %46 = arith.mulf %cst_49, %22 : f32
    %cst_50 = arith.constant 0.277777791 : f32
    %47 = arith.addf %cst_50, %46 : f32
    %cst_51 = arith.constant -0.0462962948 : f32
    %48 = arith.mulf %cst_51, %19 : f32
    %cst_52 = arith.constant 0.0925925895 : f32
    %49 = arith.mulf %cst_52, %21 : f32
    %50 = arith.addf %48, %49 : f32
    %cst_53 = arith.constant -0.416666657 : f32
    %51 = arith.mulf %cst_53, %23 : f32
    %cst_54 = arith.constant -0.0462962948 : f32
    %52 = arith.mulf %cst_54, %18 : f32
    %cst_55 = arith.constant 0.185185179 : f32
    %53 = arith.addf %cst_55, %52 : f32
    %cst_56 = arith.constant -0.0925925895 : f32
    %54 = arith.mulf %cst_56, %20 : f32
    %55 = arith.addf %53, %54 : f32
    %cst_57 = arith.constant 0.277777791 : f32
    %56 = arith.mulf %cst_57, %22 : f32
    %cst_58 = arith.constant -0.277777791 : f32
    %57 = arith.addf %cst_58, %56 : f32
    %cst_59 = arith.constant -0.0462962948 : f32
    %58 = arith.mulf %cst_59, %19 : f32
    %cst_60 = arith.constant 0.0925925895 : f32
    %59 = arith.mulf %cst_60, %21 : f32
    %60 = arith.addf %58, %59 : f32
    %cst_61 = arith.constant 0.416666657 : f32
    %61 = arith.mulf %cst_61, %23 : f32
    %cst_62 = arith.constant -0.0462962948 : f32
    %62 = arith.mulf %cst_62, %18 : f32
    %cst_63 = arith.constant 0.185185179 : f32
    %63 = arith.addf %cst_63, %62 : f32
    %cst_64 = arith.constant -0.0925925895 : f32
    %64 = arith.mulf %cst_64, %20 : f32
    %65 = arith.addf %63, %64 : f32
    %cst_65 = arith.constant 0.277777791 : f32
    %66 = arith.mulf %cst_65, %22 : f32
    %cst_66 = arith.constant -0.277777791 : f32
    %67 = arith.addf %cst_66, %66 : f32
    %cst_67 = arith.constant -0.0462962948 : f32
    %68 = arith.mulf %cst_67, %19 : f32
    %cst_68 = arith.constant 0.0925925895 : f32
    %69 = arith.mulf %cst_68, %21 : f32
    %70 = arith.addf %68, %69 : f32
    %cst_69 = arith.constant -0.416666657 : f32
    %71 = arith.mulf %cst_69, %23 : f32
    %cst_70 = arith.constant 0.0925925895 : f32
    %72 = arith.mulf %cst_70, %18 : f32
    %cst_71 = arith.constant 0.185185179 : f32
    %73 = arith.addf %cst_71, %72 : f32
    %cst_72 = arith.constant 0.0462962948 : f32
    %74 = arith.mulf %cst_72, %20 : f32
    %75 = arith.addf %73, %74 : f32
    %cst_73 = arith.constant 0.138888896 : f32
    %76 = arith.mulf %cst_73, %22 : f32
    %cst_74 = arith.constant 0.277777791 : f32
    %77 = arith.addf %cst_74, %76 : f32
    %cst_75 = arith.constant 0.138888896 : f32
    %78 = arith.mulf %cst_75, %22 : f32
    %cst_76 = arith.constant 0.277777791 : f32
    %79 = arith.addf %cst_76, %78 : f32
    %cst_77 = arith.constant 0.0925925895 : f32
    %80 = arith.mulf %cst_77, %19 : f32
    %cst_78 = arith.constant -0.0462962948 : f32
    %81 = arith.mulf %cst_78, %21 : f32
    %82 = arith.addf %80, %81 : f32
    %cst_79 = arith.constant 0.416666657 : f32
    %83 = arith.mulf %cst_79, %24 : f32
    %cst_80 = arith.constant 0.0925925895 : f32
    %84 = arith.mulf %cst_80, %18 : f32
    %cst_81 = arith.constant 0.185185179 : f32
    %85 = arith.addf %cst_81, %84 : f32
    %cst_82 = arith.constant 0.0462962948 : f32
    %86 = arith.mulf %cst_82, %20 : f32
    %87 = arith.addf %85, %86 : f32
    %cst_83 = arith.constant -0.138888896 : f32
    %88 = arith.mulf %cst_83, %22 : f32
    %cst_84 = arith.constant -0.277777791 : f32
    %89 = arith.addf %cst_84, %88 : f32
    %cst_85 = arith.constant 0.138888896 : f32
    %90 = arith.mulf %cst_85, %22 : f32
    %cst_86 = arith.constant 0.277777791 : f32
    %91 = arith.addf %cst_86, %90 : f32
    %cst_87 = arith.constant 0.0925925895 : f32
    %92 = arith.mulf %cst_87, %19 : f32
    %cst_88 = arith.constant -0.0462962948 : f32
    %93 = arith.mulf %cst_88, %21 : f32
    %94 = arith.addf %92, %93 : f32
    %cst_89 = arith.constant -0.416666657 : f32
    %95 = arith.mulf %cst_89, %24 : f32
    %cst_90 = arith.constant 0.0925925895 : f32
    %96 = arith.mulf %cst_90, %18 : f32
    %cst_91 = arith.constant 0.185185179 : f32
    %97 = arith.addf %cst_91, %96 : f32
    %cst_92 = arith.constant 0.0462962948 : f32
    %98 = arith.mulf %cst_92, %20 : f32
    %99 = arith.addf %97, %98 : f32
    %cst_93 = arith.constant -0.138888896 : f32
    %100 = arith.mulf %cst_93, %22 : f32
    %cst_94 = arith.constant -0.277777791 : f32
    %101 = arith.addf %cst_94, %100 : f32
    %cst_95 = arith.constant -0.138888896 : f32
    %102 = arith.mulf %cst_95, %22 : f32
    %cst_96 = arith.constant -0.277777791 : f32
    %103 = arith.addf %cst_96, %102 : f32
    %cst_97 = arith.constant 0.0925925895 : f32
    %104 = arith.mulf %cst_97, %19 : f32
    %cst_98 = arith.constant -0.0462962948 : f32
    %105 = arith.mulf %cst_98, %21 : f32
    %106 = arith.addf %104, %105 : f32
    %cst_99 = arith.constant 0.416666657 : f32
    %107 = arith.mulf %cst_99, %24 : f32
    %cst_100 = arith.constant 0.0925925895 : f32
    %108 = arith.mulf %cst_100, %18 : f32
    %cst_101 = arith.constant 0.185185179 : f32
    %109 = arith.addf %cst_101, %108 : f32
    %cst_102 = arith.constant 0.0462962948 : f32
    %110 = arith.mulf %cst_102, %20 : f32
    %111 = arith.addf %109, %110 : f32
    %cst_103 = arith.constant 0.138888896 : f32
    %112 = arith.mulf %cst_103, %22 : f32
    %cst_104 = arith.constant 0.277777791 : f32
    %113 = arith.addf %cst_104, %112 : f32
    %cst_105 = arith.constant -0.138888896 : f32
    %114 = arith.mulf %cst_105, %22 : f32
    %cst_106 = arith.constant -0.277777791 : f32
    %115 = arith.addf %cst_106, %114 : f32
    %cst_107 = arith.constant 0.0925925895 : f32
    %116 = arith.mulf %cst_107, %19 : f32
    %cst_108 = arith.constant -0.0462962948 : f32
    %117 = arith.mulf %cst_108, %21 : f32
    %118 = arith.addf %116, %117 : f32
    %cst_109 = arith.constant -0.416666657 : f32
    %119 = arith.mulf %cst_109, %24 : f32
    %120 = tpu.iota {dimensions = array<i32: 1>} : vector<2x128xi32>
    %c16_i32 = arith.constant 16 : i32
    %c0_i32 = arith.constant 0 : i32
    %121 = arith.cmpi eq, %c16_i32, %c0_i32 : i32
    %c1_i32 = arith.constant 1 : i32
    %122 = arith.select %121, %c1_i32, %c16_i32 : i32
    %123 = vector.broadcast %122 : i32 to vector<2x128xi32>
    %124 = arith.remsi %120, %123 : vector<2x128xi32>
    %c0_i32_110 = arith.constant 0 : i32
    %125 = vector.broadcast %c0_i32_110 : i32 to vector<2x128xi32>
    %126 = arith.cmpi ne, %124, %125 : vector<2x128xi32>
    %c0_i32_111 = arith.constant 0 : i32
    %127 = vector.broadcast %c0_i32_111 : i32 to vector<2x128xi32>
    %128 = arith.cmpi slt, %124, %127 : vector<2x128xi32>
    %c0_i32_112 = arith.constant 0 : i32
    %129 = arith.cmpi slt, %122, %c0_i32_112 : i32
    %130 = vector.broadcast %129 : i1 to vector<2x128xi1>
    %131 = vector.broadcast %130 : vector<2x128xi1> to vector<2x128xi1>
    %132 = arith.xori %128, %131 : vector<2x128xi1>
    %133 = arith.andi %132, %126 : vector<2x128xi1>
    %134 = vector.broadcast %122 : i32 to vector<2x128xi32>
    %135 = arith.addi %124, %134 : vector<2x128xi32>
    %136 = arith.select %133, %135, %124 : vector<2x128xi1>, vector<2x128xi32>
    %c0_i32_113 = arith.constant 0 : i32
    %137 = vector.broadcast %c0_i32_113 : i32 to vector<2x128xi32>
    %138 = arith.cmpi eq, %136, %137 : vector<2x128xi32>
    %c15_i32 = arith.constant 15 : i32
    %139 = vector.broadcast %c15_i32 : i32 to vector<2x128xi32>
    %140 = arith.cmpi eq, %136, %139 : vector<2x128xi32>
    %c16_i32_114 = arith.constant 16 : i32
    %141 = vector.broadcast %c16_i32_114 : i32 to vector<2x128xi32>
    %142 = arith.cmpi slt, %120, %141 : vector<2x128xi32>
    %c112_i32 = arith.constant 112 : i32
    %143 = vector.broadcast %c112_i32 : i32 to vector<2x128xi32>
    %144 = arith.cmpi sge, %120, %143 : vector<2x128xi32>
    %145 = vector.extract_strided_slice %3 {offsets = [0, 15], sizes = [2, 113], strides = [1, 1]} : vector<2x128xf32> to vector<2x113xf32>
    %146 = vector.extract_strided_slice %3 {offsets = [0, 0], sizes = [2, 15], strides = [1, 1]} : vector<2x128xf32> to vector<2x15xf32>
    %147 = tpu.concatenate %145, %146 in 1 : vector<2x113xf32>, vector<2x15xf32> -> vector<2x128xf32>
    %148 = vector.extract_strided_slice %3 {offsets = [0, 127], sizes = [2, 1], strides = [1, 1]} : vector<2x128xf32> to vector<2x1xf32>
    %149 = vector.extract_strided_slice %3 {offsets = [0, 0], sizes = [2, 127], strides = [1, 1]} : vector<2x128xf32> to vector<2x127xf32>
    %150 = tpu.concatenate %148, %149 in 1 : vector<2x1xf32>, vector<2x127xf32> -> vector<2x128xf32>
    %151 = arith.select %138, %147, %150 : vector<2x128xi1>, vector<2x128xf32>
    %152 = vector.extract_strided_slice %5 {offsets = [0, 112], sizes = [2, 16], strides = [1, 1]} : vector<2x128xf32> to vector<2x16xf32>
    %153 = vector.extract_strided_slice %5 {offsets = [0, 0], sizes = [2, 112], strides = [1, 1]} : vector<2x128xf32> to vector<2x112xf32>
    %154 = tpu.concatenate %152, %153 in 1 : vector<2x16xf32>, vector<2x112xf32> -> vector<2x128xf32>
    %155 = vector.extract_strided_slice %154 {offsets = [1, 0], sizes = [1, 128], strides = [1, 1]} : vector<2x128xf32> to vector<1x128xf32>
    %156 = vector.extract_strided_slice %154 {offsets = [0, 0], sizes = [1, 128], strides = [1, 1]} : vector<2x128xf32> to vector<1x128xf32>
    %157 = tpu.concatenate %155, %156 in 0 : vector<1x128xf32>, vector<1x128xf32> -> vector<2x128xf32>
    %158 = arith.select %142, %157, %154 : vector<2x128xi1>, vector<2x128xf32>
    %159 = vector.extract_strided_slice %7 {offsets = [0, 113], sizes = [2, 15], strides = [1, 1]} : vector<2x128xf32> to vector<2x15xf32>
    %160 = vector.extract_strided_slice %7 {offsets = [0, 0], sizes = [2, 113], strides = [1, 1]} : vector<2x128xf32> to vector<2x113xf32>
    %161 = tpu.concatenate %159, %160 in 1 : vector<2x15xf32>, vector<2x113xf32> -> vector<2x128xf32>
    %162 = vector.extract_strided_slice %7 {offsets = [0, 1], sizes = [2, 127], strides = [1, 1]} : vector<2x128xf32> to vector<2x127xf32>
    %163 = vector.extract_strided_slice %7 {offsets = [0, 0], sizes = [2, 1], strides = [1, 1]} : vector<2x128xf32> to vector<2x1xf32>
    %164 = tpu.concatenate %162, %163 in 1 : vector<2x127xf32>, vector<2x1xf32> -> vector<2x128xf32>
    %165 = arith.select %140, %161, %164 : vector<2x128xi1>, vector<2x128xf32>
    %166 = vector.extract_strided_slice %9 {offsets = [0, 16], sizes = [2, 112], strides = [1, 1]} : vector<2x128xf32> to vector<2x112xf32>
    %167 = vector.extract_strided_slice %9 {offsets = [0, 0], sizes = [2, 16], strides = [1, 1]} : vector<2x128xf32> to vector<2x16xf32>
    %168 = tpu.concatenate %166, %167 in 1 : vector<2x112xf32>, vector<2x16xf32> -> vector<2x128xf32>
    %169 = vector.extract_strided_slice %168 {offsets = [1, 0], sizes = [1, 128], strides = [1, 1]} : vector<2x128xf32> to vector<1x128xf32>
    %170 = vector.extract_strided_slice %168 {offsets = [0, 0], sizes = [1, 128], strides = [1, 1]} : vector<2x128xf32> to vector<1x128xf32>
    %171 = tpu.concatenate %169, %170 in 0 : vector<1x128xf32>, vector<1x128xf32> -> vector<2x128xf32>
    %172 = arith.select %144, %171, %168 : vector<2x128xi1>, vector<2x128xf32>
    %173 = vector.extract_strided_slice %11 {offsets = [0, 15], sizes = [2, 113], strides = [1, 1]} : vector<2x128xf32> to vector<2x113xf32>
    %174 = vector.extract_strided_slice %11 {offsets = [0, 0], sizes = [2, 15], strides = [1, 1]} : vector<2x128xf32> to vector<2x15xf32>
    %175 = tpu.concatenate %173, %174 in 1 : vector<2x113xf32>, vector<2x15xf32> -> vector<2x128xf32>
    %176 = vector.extract_strided_slice %11 {offsets = [0, 127], sizes = [2, 1], strides = [1, 1]} : vector<2x128xf32> to vector<2x1xf32>
    %177 = vector.extract_strided_slice %11 {offsets = [0, 0], sizes = [2, 127], strides = [1, 1]} : vector<2x128xf32> to vector<2x127xf32>
    %178 = tpu.concatenate %176, %177 in 1 : vector<2x1xf32>, vector<2x127xf32> -> vector<2x128xf32>
    %179 = arith.select %138, %175, %178 : vector<2x128xi1>, vector<2x128xf32>
    %180 = vector.extract_strided_slice %179 {offsets = [0, 112], sizes = [2, 16], strides = [1, 1]} : vector<2x128xf32> to vector<2x16xf32>
    %181 = vector.extract_strided_slice %179 {offsets = [0, 0], sizes = [2, 112], strides = [1, 1]} : vector<2x128xf32> to vector<2x112xf32>
    %182 = tpu.concatenate %180, %181 in 1 : vector<2x16xf32>, vector<2x112xf32> -> vector<2x128xf32>
    %183 = vector.extract_strided_slice %182 {offsets = [1, 0], sizes = [1, 128], strides = [1, 1]} : vector<2x128xf32> to vector<1x128xf32>
    %184 = vector.extract_strided_slice %182 {offsets = [0, 0], sizes = [1, 128], strides = [1, 1]} : vector<2x128xf32> to vector<1x128xf32>
    %185 = tpu.concatenate %183, %184 in 0 : vector<1x128xf32>, vector<1x128xf32> -> vector<2x128xf32>
    %186 = arith.select %142, %185, %182 : vector<2x128xi1>, vector<2x128xf32>
    %187 = vector.extract_strided_slice %13 {offsets = [0, 113], sizes = [2, 15], strides = [1, 1]} : vector<2x128xf32> to vector<2x15xf32>
    %188 = vector.extract_strided_slice %13 {offsets = [0, 0], sizes = [2, 113], strides = [1, 1]} : vector<2x128xf32> to vector<2x113xf32>
    %189 = tpu.concatenate %187, %188 in 1 : vector<2x15xf32>, vector<2x113xf32> -> vector<2x128xf32>
    %190 = vector.extract_strided_slice %13 {offsets = [0, 1], sizes = [2, 127], strides = [1, 1]} : vector<2x128xf32> to vector<2x127xf32>
    %191 = vector.extract_strided_slice %13 {offsets = [0, 0], sizes = [2, 1], strides = [1, 1]} : vector<2x128xf32> to vector<2x1xf32>
    %192 = tpu.concatenate %190, %191 in 1 : vector<2x127xf32>, vector<2x1xf32> -> vector<2x128xf32>
    %193 = arith.select %140, %189, %192 : vector<2x128xi1>, vector<2x128xf32>
    %194 = vector.extract_strided_slice %193 {offsets = [0, 112], sizes = [2, 16], strides = [1, 1]} : vector<2x128xf32> to vector<2x16xf32>
    %195 = vector.extract_strided_slice %193 {offsets = [0, 0], sizes = [2, 112], strides = [1, 1]} : vector<2x128xf32> to vector<2x112xf32>
    %196 = tpu.concatenate %194, %195 in 1 : vector<2x16xf32>, vector<2x112xf32> -> vector<2x128xf32>
    %197 = vector.extract_strided_slice %196 {offsets = [1, 0], sizes = [1, 128], strides = [1, 1]} : vector<2x128xf32> to vector<1x128xf32>
    %198 = vector.extract_strided_slice %196 {offsets = [0, 0], sizes = [1, 128], strides = [1, 1]} : vector<2x128xf32> to vector<1x128xf32>
    %199 = tpu.concatenate %197, %198 in 0 : vector<1x128xf32>, vector<1x128xf32> -> vector<2x128xf32>
    %200 = arith.select %142, %199, %196 : vector<2x128xi1>, vector<2x128xf32>
    %201 = vector.extract_strided_slice %15 {offsets = [0, 113], sizes = [2, 15], strides = [1, 1]} : vector<2x128xf32> to vector<2x15xf32>
    %202 = vector.extract_strided_slice %15 {offsets = [0, 0], sizes = [2, 113], strides = [1, 1]} : vector<2x128xf32> to vector<2x113xf32>
    %203 = tpu.concatenate %201, %202 in 1 : vector<2x15xf32>, vector<2x113xf32> -> vector<2x128xf32>
    %204 = vector.extract_strided_slice %15 {offsets = [0, 1], sizes = [2, 127], strides = [1, 1]} : vector<2x128xf32> to vector<2x127xf32>
    %205 = vector.extract_strided_slice %15 {offsets = [0, 0], sizes = [2, 1], strides = [1, 1]} : vector<2x128xf32> to vector<2x1xf32>
    %206 = tpu.concatenate %204, %205 in 1 : vector<2x127xf32>, vector<2x1xf32> -> vector<2x128xf32>
    %207 = arith.select %140, %203, %206 : vector<2x128xi1>, vector<2x128xf32>
    %208 = vector.extract_strided_slice %207 {offsets = [0, 16], sizes = [2, 112], strides = [1, 1]} : vector<2x128xf32> to vector<2x112xf32>
    %209 = vector.extract_strided_slice %207 {offsets = [0, 0], sizes = [2, 16], strides = [1, 1]} : vector<2x128xf32> to vector<2x16xf32>
    %210 = tpu.concatenate %208, %209 in 1 : vector<2x112xf32>, vector<2x16xf32> -> vector<2x128xf32>
    %211 = vector.extract_strided_slice %210 {offsets = [1, 0], sizes = [1, 128], strides = [1, 1]} : vector<2x128xf32> to vector<1x128xf32>
    %212 = vector.extract_strided_slice %210 {offsets = [0, 0], sizes = [1, 128], strides = [1, 1]} : vector<2x128xf32> to vector<1x128xf32>
    %213 = tpu.concatenate %211, %212 in 0 : vector<1x128xf32>, vector<1x128xf32> -> vector<2x128xf32>
    %214 = arith.select %144, %213, %210 : vector<2x128xi1>, vector<2x128xf32>
    %215 = vector.extract_strided_slice %17 {offsets = [0, 15], sizes = [2, 113], strides = [1, 1]} : vector<2x128xf32> to vector<2x113xf32>
    %216 = vector.extract_strided_slice %17 {offsets = [0, 0], sizes = [2, 15], strides = [1, 1]} : vector<2x128xf32> to vector<2x15xf32>
    %217 = tpu.concatenate %215, %216 in 1 : vector<2x113xf32>, vector<2x15xf32> -> vector<2x128xf32>
    %218 = vector.extract_strided_slice %17 {offsets = [0, 127], sizes = [2, 1], strides = [1, 1]} : vector<2x128xf32> to vector<2x1xf32>
    %219 = vector.extract_strided_slice %17 {offsets = [0, 0], sizes = [2, 127], strides = [1, 1]} : vector<2x128xf32> to vector<2x127xf32>
    %220 = tpu.concatenate %218, %219 in 1 : vector<2x1xf32>, vector<2x127xf32> -> vector<2x128xf32>
    %221 = arith.select %138, %217, %220 : vector<2x128xi1>, vector<2x128xf32>
    %222 = vector.extract_strided_slice %221 {offsets = [0, 16], sizes = [2, 112], strides = [1, 1]} : vector<2x128xf32> to vector<2x112xf32>
    %223 = vector.extract_strided_slice %221 {offsets = [0, 0], sizes = [2, 16], strides = [1, 1]} : vector<2x128xf32> to vector<2x16xf32>
    %224 = tpu.concatenate %222, %223 in 1 : vector<2x112xf32>, vector<2x16xf32> -> vector<2x128xf32>
    %225 = vector.extract_strided_slice %224 {offsets = [1, 0], sizes = [1, 128], strides = [1, 1]} : vector<2x128xf32> to vector<1x128xf32>
    %226 = vector.extract_strided_slice %224 {offsets = [0, 0], sizes = [1, 128], strides = [1, 1]} : vector<2x128xf32> to vector<1x128xf32>
    %227 = tpu.concatenate %225, %226 in 0 : vector<1x128xf32>, vector<1x128xf32> -> vector<2x128xf32>
    %228 = arith.select %144, %227, %224 : vector<2x128xi1>, vector<2x128xf32>
    %229 = arith.addf %1, %151 : vector<2x128xf32>
    %230 = arith.addf %229, %158 : vector<2x128xf32>
    %231 = arith.addf %230, %165 : vector<2x128xf32>
    %232 = arith.addf %231, %172 : vector<2x128xf32>
    %233 = arith.addf %232, %186 : vector<2x128xf32>
    %234 = arith.addf %233, %200 : vector<2x128xf32>
    %235 = arith.addf %234, %214 : vector<2x128xf32>
    %236 = arith.addf %235, %228 : vector<2x128xf32>
    %237 = arith.subf %151, %165 : vector<2x128xf32>
    %238 = arith.addf %237, %186 : vector<2x128xf32>
    %239 = arith.subf %238, %200 : vector<2x128xf32>
    %240 = arith.subf %239, %214 : vector<2x128xf32>
    %241 = arith.addf %240, %228 : vector<2x128xf32>
    %242 = arith.subf %158, %172 : vector<2x128xf32>
    %243 = arith.addf %242, %186 : vector<2x128xf32>
    %244 = arith.addf %243, %200 : vector<2x128xf32>
    %245 = arith.subf %244, %214 : vector<2x128xf32>
    %246 = arith.subf %245, %228 : vector<2x128xf32>
    %247 = arith.mulf %241, %241 : vector<2x128xf32>
    %248 = arith.mulf %246, %246 : vector<2x128xf32>
    %249 = arith.addf %247, %248 : vector<2x128xf32>
    %250 = arith.subf %247, %248 : vector<2x128xf32>
    %251 = arith.mulf %241, %246 : vector<2x128xf32>
    %cst_115 = arith.constant -0.666666686 : f32
    %252 = vector.broadcast %cst_115 : f32 to vector<2x128xf32>
    %253 = arith.mulf %252, %1 : vector<2x128xf32>
    %254 = vector.broadcast %28 : f32 to vector<2x128xf32>
    %255 = arith.mulf %254, %236 : vector<2x128xf32>
    %256 = arith.addf %253, %255 : vector<2x128xf32>
    %257 = vector.broadcast %31 : f32 to vector<2x128xf32>
    %258 = arith.mulf %257, %249 : vector<2x128xf32>
    %259 = arith.addf %256, %258 : vector<2x128xf32>
    %cst_116 = arith.constant -0.666666686 : f32
    %260 = vector.broadcast %cst_116 : f32 to vector<2x128xf32>
    %261 = arith.mulf %260, %151 : vector<2x128xf32>
    %262 = vector.broadcast %35 : f32 to vector<2x128xf32>
    %263 = arith.mulf %262, %236 : vector<2x128xf32>
    %264 = arith.addf %261, %263 : vector<2x128xf32>
    %265 = vector.broadcast %37 : f32 to vector<2x128xf32>
    %266 = arith.mulf %265, %241 : vector<2x128xf32>
    %267 = arith.addf %264, %266 : vector<2x128xf32>
    %268 = vector.broadcast %40 : f32 to vector<2x128xf32>
    %269 = arith.mulf %268, %249 : vector<2x128xf32>
    %270 = arith.addf %267, %269 : vector<2x128xf32>
    %271 = vector.broadcast %41 : f32 to vector<2x128xf32>
    %272 = arith.mulf %271, %250 : vector<2x128xf32>
    %273 = arith.addf %270, %272 : vector<2x128xf32>
    %cst_117 = arith.constant -0.666666686 : f32
    %274 = vector.broadcast %cst_117 : f32 to vector<2x128xf32>
    %275 = arith.mulf %274, %158 : vector<2x128xf32>
    %276 = vector.broadcast %45 : f32 to vector<2x128xf32>
    %277 = arith.mulf %276, %236 : vector<2x128xf32>
    %278 = arith.addf %275, %277 : vector<2x128xf32>
    %279 = vector.broadcast %47 : f32 to vector<2x128xf32>
    %280 = arith.mulf %279, %246 : vector<2x128xf32>
    %281 = arith.addf %278, %280 : vector<2x128xf32>
    %282 = vector.broadcast %50 : f32 to vector<2x128xf32>
    %283 = arith.mulf %282, %249 : vector<2x128xf32>
    %284 = arith.addf %281, %283 : vector<2x128xf32>
    %285 = vector.broadcast %51 : f32 to vector<2x128xf32>
    %286 = arith.mulf %285, %250 : vector<2x128xf32>
    %287 = arith.addf %284, %286 : vector<2x128xf32>
    %cst_118 = arith.constant -0.666666686 : f32
    %288 = vector.broadcast %cst_118 : f32 to vector<2x128xf32>
    %289 = arith.mulf %288, %165 : vector<2x128xf32>
    %290 = vector.broadcast %55 : f32 to vector<2x128xf32>
    %291 = arith.mulf %290, %236 : vector<2x128xf32>
    %292 = arith.addf %289, %291 : vector<2x128xf32>
    %293 = vector.broadcast %57 : f32 to vector<2x128xf32>
    %294 = arith.mulf %293, %241 : vector<2x128xf32>
    %295 = arith.addf %292, %294 : vector<2x128xf32>
    %296 = vector.broadcast %60 : f32 to vector<2x128xf32>
    %297 = arith.mulf %296, %249 : vector<2x128xf32>
    %298 = arith.addf %295, %297 : vector<2x128xf32>
    %299 = vector.broadcast %61 : f32 to vector<2x128xf32>
    %300 = arith.mulf %299, %250 : vector<2x128xf32>
    %301 = arith.addf %298, %300 : vector<2x128xf32>
    %cst_119 = arith.constant -0.666666686 : f32
    %302 = vector.broadcast %cst_119 : f32 to vector<2x128xf32>
    %303 = arith.mulf %302, %172 : vector<2x128xf32>
    %304 = vector.broadcast %65 : f32 to vector<2x128xf32>
    %305 = arith.mulf %304, %236 : vector<2x128xf32>
    %306 = arith.addf %303, %305 : vector<2x128xf32>
    %307 = vector.broadcast %67 : f32 to vector<2x128xf32>
    %308 = arith.mulf %307, %246 : vector<2x128xf32>
    %309 = arith.addf %306, %308 : vector<2x128xf32>
    %310 = vector.broadcast %70 : f32 to vector<2x128xf32>
    %311 = arith.mulf %310, %249 : vector<2x128xf32>
    %312 = arith.addf %309, %311 : vector<2x128xf32>
    %313 = vector.broadcast %71 : f32 to vector<2x128xf32>
    %314 = arith.mulf %313, %250 : vector<2x128xf32>
    %315 = arith.addf %312, %314 : vector<2x128xf32>
    %cst_120 = arith.constant -0.666666686 : f32
    %316 = vector.broadcast %cst_120 : f32 to vector<2x128xf32>
    %317 = arith.mulf %316, %186 : vector<2x128xf32>
    %318 = vector.broadcast %75 : f32 to vector<2x128xf32>
    %319 = arith.mulf %318, %236 : vector<2x128xf32>
    %320 = arith.addf %317, %319 : vector<2x128xf32>
    %321 = vector.broadcast %77 : f32 to vector<2x128xf32>
    %322 = arith.mulf %321, %241 : vector<2x128xf32>
    %323 = arith.addf %320, %322 : vector<2x128xf32>
    %324 = vector.broadcast %79 : f32 to vector<2x128xf32>
    %325 = arith.mulf %324, %246 : vector<2x128xf32>
    %326 = arith.addf %323, %325 : vector<2x128xf32>
    %327 = vector.broadcast %82 : f32 to vector<2x128xf32>
    %328 = arith.mulf %327, %249 : vector<2x128xf32>
    %329 = arith.addf %326, %328 : vector<2x128xf32>
    %330 = vector.broadcast %83 : f32 to vector<2x128xf32>
    %331 = arith.mulf %330, %251 : vector<2x128xf32>
    %332 = arith.addf %329, %331 : vector<2x128xf32>
    %cst_121 = arith.constant -0.666666686 : f32
    %333 = vector.broadcast %cst_121 : f32 to vector<2x128xf32>
    %334 = arith.mulf %333, %200 : vector<2x128xf32>
    %335 = vector.broadcast %87 : f32 to vector<2x128xf32>
    %336 = arith.mulf %335, %236 : vector<2x128xf32>
    %337 = arith.addf %334, %336 : vector<2x128xf32>
    %338 = vector.broadcast %89 : f32 to vector<2x128xf32>
    %339 = arith.mulf %338, %241 : vector<2x128xf32>
    %340 = arith.addf %337, %339 : vector<2x128xf32>
    %341 = vector.broadcast %91 : f32 to vector<2x128xf32>
    %342 = arith.mulf %341, %246 : vector<2x128xf32>
    %343 = arith.addf %340, %342 : vector<2x128xf32>
    %344 = vector.broadcast %94 : f32 to vector<2x128xf32>
    %345 = arith.mulf %344, %249 : vector<2x128xf32>
    %346 = arith.addf %343, %345 : vector<2x128xf32>
    %347 = vector.broadcast %95 : f32 to vector<2x128xf32>
    %348 = arith.mulf %347, %251 : vector<2x128xf32>
    %349 = arith.addf %346, %348 : vector<2x128xf32>
    %cst_122 = arith.constant -0.666666686 : f32
    %350 = vector.broadcast %cst_122 : f32 to vector<2x128xf32>
    %351 = arith.mulf %350, %214 : vector<2x128xf32>
    %352 = vector.broadcast %99 : f32 to vector<2x128xf32>
    %353 = arith.mulf %352, %236 : vector<2x128xf32>
    %354 = arith.addf %351, %353 : vector<2x128xf32>
    %355 = vector.broadcast %101 : f32 to vector<2x128xf32>
    %356 = arith.mulf %355, %241 : vector<2x128xf32>
    %357 = arith.addf %354, %356 : vector<2x128xf32>
    %358 = vector.broadcast %103 : f32 to vector<2x128xf32>
    %359 = arith.mulf %358, %246 : vector<2x128xf32>
    %360 = arith.addf %357, %359 : vector<2x128xf32>
    %361 = vector.broadcast %106 : f32 to vector<2x128xf32>
    %362 = arith.mulf %361, %249 : vector<2x128xf32>
    %363 = arith.addf %360, %362 : vector<2x128xf32>
    %364 = vector.broadcast %107 : f32 to vector<2x128xf32>
    %365 = arith.mulf %364, %251 : vector<2x128xf32>
    %366 = arith.addf %363, %365 : vector<2x128xf32>
    %cst_123 = arith.constant -0.666666686 : f32
    %367 = vector.broadcast %cst_123 : f32 to vector<2x128xf32>
    %368 = arith.mulf %367, %228 : vector<2x128xf32>
    %369 = vector.broadcast %111 : f32 to vector<2x128xf32>
    %370 = arith.mulf %369, %236 : vector<2x128xf32>
    %371 = arith.addf %368, %370 : vector<2x128xf32>
    %372 = vector.broadcast %113 : f32 to vector<2x128xf32>
    %373 = arith.mulf %372, %241 : vector<2x128xf32>
    %374 = arith.addf %371, %373 : vector<2x128xf32>
    %375 = vector.broadcast %115 : f32 to vector<2x128xf32>
    %376 = arith.mulf %375, %246 : vector<2x128xf32>
    %377 = arith.addf %374, %376 : vector<2x128xf32>
    %378 = vector.broadcast %118 : f32 to vector<2x128xf32>
    %379 = arith.mulf %378, %249 : vector<2x128xf32>
    %380 = arith.addf %377, %379 : vector<2x128xf32>
    %381 = vector.broadcast %119 : f32 to vector<2x128xf32>
    %382 = arith.mulf %381, %251 : vector<2x128xf32>
    %383 = arith.addf %380, %382 : vector<2x128xf32>
    %384 = vector.extract_strided_slice %273 {offsets = [0, 15], sizes = [2, 113], strides = [1, 1]} : vector<2x128xf32> to vector<2x113xf32>
    %385 = vector.extract_strided_slice %273 {offsets = [0, 0], sizes = [2, 15], strides = [1, 1]} : vector<2x128xf32> to vector<2x15xf32>
    %386 = tpu.concatenate %384, %385 in 1 : vector<2x113xf32>, vector<2x15xf32> -> vector<2x128xf32>
    %387 = vector.extract_strided_slice %273 {offsets = [0, 127], sizes = [2, 1], strides = [1, 1]} : vector<2x128xf32> to vector<2x1xf32>
    %388 = vector.extract_strided_slice %273 {offsets = [0, 0], sizes = [2, 127], strides = [1, 1]} : vector<2x128xf32> to vector<2x127xf32>
    %389 = tpu.concatenate %387, %388 in 1 : vector<2x1xf32>, vector<2x127xf32> -> vector<2x128xf32>
    %390 = arith.select %138, %386, %389 : vector<2x128xi1>, vector<2x128xf32>
    %391 = vector.extract_strided_slice %287 {offsets = [0, 112], sizes = [2, 16], strides = [1, 1]} : vector<2x128xf32> to vector<2x16xf32>
    %392 = vector.extract_strided_slice %287 {offsets = [0, 0], sizes = [2, 112], strides = [1, 1]} : vector<2x128xf32> to vector<2x112xf32>
    %393 = tpu.concatenate %391, %392 in 1 : vector<2x16xf32>, vector<2x112xf32> -> vector<2x128xf32>
    %394 = vector.extract_strided_slice %393 {offsets = [1, 0], sizes = [1, 128], strides = [1, 1]} : vector<2x128xf32> to vector<1x128xf32>
    %395 = vector.extract_strided_slice %393 {offsets = [0, 0], sizes = [1, 128], strides = [1, 1]} : vector<2x128xf32> to vector<1x128xf32>
    %396 = tpu.concatenate %394, %395 in 0 : vector<1x128xf32>, vector<1x128xf32> -> vector<2x128xf32>
    %397 = arith.select %142, %396, %393 : vector<2x128xi1>, vector<2x128xf32>
    %398 = vector.extract_strided_slice %301 {offsets = [0, 113], sizes = [2, 15], strides = [1, 1]} : vector<2x128xf32> to vector<2x15xf32>
    %399 = vector.extract_strided_slice %301 {offsets = [0, 0], sizes = [2, 113], strides = [1, 1]} : vector<2x128xf32> to vector<2x113xf32>
    %400 = tpu.concatenate %398, %399 in 1 : vector<2x15xf32>, vector<2x113xf32> -> vector<2x128xf32>
    %401 = vector.extract_strided_slice %301 {offsets = [0, 1], sizes = [2, 127], strides = [1, 1]} : vector<2x128xf32> to vector<2x127xf32>
    %402 = vector.extract_strided_slice %301 {offsets = [0, 0], sizes = [2, 1], strides = [1, 1]} : vector<2x128xf32> to vector<2x1xf32>
    %403 = tpu.concatenate %401, %402 in 1 : vector<2x127xf32>, vector<2x1xf32> -> vector<2x128xf32>
    %404 = arith.select %140, %400, %403 : vector<2x128xi1>, vector<2x128xf32>
    %405 = vector.extract_strided_slice %315 {offsets = [0, 16], sizes = [2, 112], strides = [1, 1]} : vector<2x128xf32> to vector<2x112xf32>
    %406 = vector.extract_strided_slice %315 {offsets = [0, 0], sizes = [2, 16], strides = [1, 1]} : vector<2x128xf32> to vector<2x16xf32>
    %407 = tpu.concatenate %405, %406 in 1 : vector<2x112xf32>, vector<2x16xf32> -> vector<2x128xf32>
    %408 = vector.extract_strided_slice %407 {offsets = [1, 0], sizes = [1, 128], strides = [1, 1]} : vector<2x128xf32> to vector<1x128xf32>
    %409 = vector.extract_strided_slice %407 {offsets = [0, 0], sizes = [1, 128], strides = [1, 1]} : vector<2x128xf32> to vector<1x128xf32>
    %410 = tpu.concatenate %408, %409 in 0 : vector<1x128xf32>, vector<1x128xf32> -> vector<2x128xf32>
    %411 = arith.select %144, %410, %407 : vector<2x128xi1>, vector<2x128xf32>
    %412 = vector.extract_strided_slice %332 {offsets = [0, 15], sizes = [2, 113], strides = [1, 1]} : vector<2x128xf32> to vector<2x113xf32>
    %413 = vector.extract_strided_slice %332 {offsets = [0, 0], sizes = [2, 15], strides = [1, 1]} : vector<2x128xf32> to vector<2x15xf32>
    %414 = tpu.concatenate %412, %413 in 1 : vector<2x113xf32>, vector<2x15xf32> -> vector<2x128xf32>
    %415 = vector.extract_strided_slice %332 {offsets = [0, 127], sizes = [2, 1], strides = [1, 1]} : vector<2x128xf32> to vector<2x1xf32>
    %416 = vector.extract_strided_slice %332 {offsets = [0, 0], sizes = [2, 127], strides = [1, 1]} : vector<2x128xf32> to vector<2x127xf32>
    %417 = tpu.concatenate %415, %416 in 1 : vector<2x1xf32>, vector<2x127xf32> -> vector<2x128xf32>
    %418 = arith.select %138, %414, %417 : vector<2x128xi1>, vector<2x128xf32>
    %419 = vector.extract_strided_slice %418 {offsets = [0, 112], sizes = [2, 16], strides = [1, 1]} : vector<2x128xf32> to vector<2x16xf32>
    %420 = vector.extract_strided_slice %418 {offsets = [0, 0], sizes = [2, 112], strides = [1, 1]} : vector<2x128xf32> to vector<2x112xf32>
    %421 = tpu.concatenate %419, %420 in 1 : vector<2x16xf32>, vector<2x112xf32> -> vector<2x128xf32>
    %422 = vector.extract_strided_slice %421 {offsets = [1, 0], sizes = [1, 128], strides = [1, 1]} : vector<2x128xf32> to vector<1x128xf32>
    %423 = vector.extract_strided_slice %421 {offsets = [0, 0], sizes = [1, 128], strides = [1, 1]} : vector<2x128xf32> to vector<1x128xf32>
    %424 = tpu.concatenate %422, %423 in 0 : vector<1x128xf32>, vector<1x128xf32> -> vector<2x128xf32>
    %425 = arith.select %142, %424, %421 : vector<2x128xi1>, vector<2x128xf32>
    %426 = vector.extract_strided_slice %349 {offsets = [0, 113], sizes = [2, 15], strides = [1, 1]} : vector<2x128xf32> to vector<2x15xf32>
    %427 = vector.extract_strided_slice %349 {offsets = [0, 0], sizes = [2, 113], strides = [1, 1]} : vector<2x128xf32> to vector<2x113xf32>
    %428 = tpu.concatenate %426, %427 in 1 : vector<2x15xf32>, vector<2x113xf32> -> vector<2x128xf32>
    %429 = vector.extract_strided_slice %349 {offsets = [0, 1], sizes = [2, 127], strides = [1, 1]} : vector<2x128xf32> to vector<2x127xf32>
    %430 = vector.extract_strided_slice %349 {offsets = [0, 0], sizes = [2, 1], strides = [1, 1]} : vector<2x128xf32> to vector<2x1xf32>
    %431 = tpu.concatenate %429, %430 in 1 : vector<2x127xf32>, vector<2x1xf32> -> vector<2x128xf32>
    %432 = arith.select %140, %428, %431 : vector<2x128xi1>, vector<2x128xf32>
    %433 = vector.extract_strided_slice %432 {offsets = [0, 112], sizes = [2, 16], strides = [1, 1]} : vector<2x128xf32> to vector<2x16xf32>
    %434 = vector.extract_strided_slice %432 {offsets = [0, 0], sizes = [2, 112], strides = [1, 1]} : vector<2x128xf32> to vector<2x112xf32>
    %435 = tpu.concatenate %433, %434 in 1 : vector<2x16xf32>, vector<2x112xf32> -> vector<2x128xf32>
    %436 = vector.extract_strided_slice %435 {offsets = [1, 0], sizes = [1, 128], strides = [1, 1]} : vector<2x128xf32> to vector<1x128xf32>
    %437 = vector.extract_strided_slice %435 {offsets = [0, 0], sizes = [1, 128], strides = [1, 1]} : vector<2x128xf32> to vector<1x128xf32>
    %438 = tpu.concatenate %436, %437 in 0 : vector<1x128xf32>, vector<1x128xf32> -> vector<2x128xf32>
    %439 = arith.select %142, %438, %435 : vector<2x128xi1>, vector<2x128xf32>
    %440 = vector.extract_strided_slice %366 {offsets = [0, 113], sizes = [2, 15], strides = [1, 1]} : vector<2x128xf32> to vector<2x15xf32>
    %441 = vector.extract_strided_slice %366 {offsets = [0, 0], sizes = [2, 113], strides = [1, 1]} : vector<2x128xf32> to vector<2x113xf32>
    %442 = tpu.concatenate %440, %441 in 1 : vector<2x15xf32>, vector<2x113xf32> -> vector<2x128xf32>
    %443 = vector.extract_strided_slice %366 {offsets = [0, 1], sizes = [2, 127], strides = [1, 1]} : vector<2x128xf32> to vector<2x127xf32>
    %444 = vector.extract_strided_slice %366 {offsets = [0, 0], sizes = [2, 1], strides = [1, 1]} : vector<2x128xf32> to vector<2x1xf32>
    %445 = tpu.concatenate %443, %444 in 1 : vector<2x127xf32>, vector<2x1xf32> -> vector<2x128xf32>
    %446 = arith.select %140, %442, %445 : vector<2x128xi1>, vector<2x128xf32>
    %447 = vector.extract_strided_slice %446 {offsets = [0, 16], sizes = [2, 112], strides = [1, 1]} : vector<2x128xf32> to vector<2x112xf32>
    %448 = vector.extract_strided_slice %446 {offsets = [0, 0], sizes = [2, 16], strides = [1, 1]} : vector<2x128xf32> to vector<2x16xf32>
    %449 = tpu.concatenate %447, %448 in 1 : vector<2x112xf32>, vector<2x16xf32> -> vector<2x128xf32>
    %450 = vector.extract_strided_slice %449 {offsets = [1, 0], sizes = [1, 128], strides = [1, 1]} : vector<2x128xf32> to vector<1x128xf32>
    %451 = vector.extract_strided_slice %449 {offsets = [0, 0], sizes = [1, 128], strides = [1, 1]} : vector<2x128xf32> to vector<1x128xf32>
    %452 = tpu.concatenate %450, %451 in 0 : vector<1x128xf32>, vector<1x128xf32> -> vector<2x128xf32>
    %453 = arith.select %144, %452, %449 : vector<2x128xi1>, vector<2x128xf32>
    %454 = vector.extract_strided_slice %383 {offsets = [0, 15], sizes = [2, 113], strides = [1, 1]} : vector<2x128xf32> to vector<2x113xf32>
    %455 = vector.extract_strided_slice %383 {offsets = [0, 0], sizes = [2, 15], strides = [1, 1]} : vector<2x128xf32> to vector<2x15xf32>
    %456 = tpu.concatenate %454, %455 in 1 : vector<2x113xf32>, vector<2x15xf32> -> vector<2x128xf32>
    %457 = vector.extract_strided_slice %383 {offsets = [0, 127], sizes = [2, 1], strides = [1, 1]} : vector<2x128xf32> to vector<2x1xf32>
    %458 = vector.extract_strided_slice %383 {offsets = [0, 0], sizes = [2, 127], strides = [1, 1]} : vector<2x128xf32> to vector<2x127xf32>
    %459 = tpu.concatenate %457, %458 in 1 : vector<2x1xf32>, vector<2x127xf32> -> vector<2x128xf32>
    %460 = arith.select %138, %456, %459 : vector<2x128xi1>, vector<2x128xf32>
    %461 = vector.extract_strided_slice %460 {offsets = [0, 16], sizes = [2, 112], strides = [1, 1]} : vector<2x128xf32> to vector<2x112xf32>
    %462 = vector.extract_strided_slice %460 {offsets = [0, 0], sizes = [2, 16], strides = [1, 1]} : vector<2x128xf32> to vector<2x16xf32>
    %463 = tpu.concatenate %461, %462 in 1 : vector<2x112xf32>, vector<2x16xf32> -> vector<2x128xf32>
    %464 = vector.extract_strided_slice %463 {offsets = [1, 0], sizes = [1, 128], strides = [1, 1]} : vector<2x128xf32> to vector<1x128xf32>
    %465 = vector.extract_strided_slice %463 {offsets = [0, 0], sizes = [1, 128], strides = [1, 1]} : vector<2x128xf32> to vector<1x128xf32>
    %466 = tpu.concatenate %464, %465 in 0 : vector<1x128xf32>, vector<1x128xf32> -> vector<2x128xf32>
    %467 = arith.select %144, %466, %463 : vector<2x128xi1>, vector<2x128xf32>
    %468 = arith.addf %259, %390 : vector<2x128xf32>
    %469 = arith.addf %468, %397 : vector<2x128xf32>
    %470 = arith.addf %469, %404 : vector<2x128xf32>
    %471 = arith.addf %470, %411 : vector<2x128xf32>
    %472 = arith.addf %471, %425 : vector<2x128xf32>
    %473 = arith.addf %472, %439 : vector<2x128xf32>
    %474 = arith.addf %473, %453 : vector<2x128xf32>
    %475 = arith.addf %474, %467 : vector<2x128xf32>
    %476 = arith.subf %390, %404 : vector<2x128xf32>
    %477 = arith.addf %476, %425 : vector<2x128xf32>
    %478 = arith.subf %477, %439 : vector<2x128xf32>
    %479 = arith.subf %478, %453 : vector<2x128xf32>
    %480 = arith.addf %479, %467 : vector<2x128xf32>
    %481 = arith.subf %397, %411 : vector<2x128xf32>
    %482 = arith.addf %481, %425 : vector<2x128xf32>
    %483 = arith.addf %482, %439 : vector<2x128xf32>
    %484 = arith.subf %483, %453 : vector<2x128xf32>
    %485 = arith.subf %484, %467 : vector<2x128xf32>
    %c0_124 = arith.constant 0 : index
    %c0_125 = arith.constant 0 : index
    %c0_126 = arith.constant 0 : index
    %c0_127 = arith.constant 0 : index
    %486 = vector.load %arg3[%c0_124, %c0_125, %c0_126, %c0_127] : memref<1x3x2x128xf32, #tpu.memory_space<vmem>>, vector<1x1x2x128xf32>
    %487 = vector.shape_cast %486 : vector<1x1x2x128xf32> to vector<2x128xf32>
    %488 = vector.shape_cast %475 : vector<2x128xf32> to vector<1x1x2x128xf32>
    tpu.vector_store %arg3[%c0_124, %c0_125, %c0_126, %c0_127], %488 {strides = array<i32>} : memref<1x3x2x128xf32, #tpu.memory_space<vmem>>, vector<1x1x2x128xf32>,
    %c0_128 = arith.constant 0 : index
    %c1_129 = arith.constant 1 : index
    %c0_130 = arith.constant 0 : index
    %c0_131 = arith.constant 0 : index
    %489 = vector.load %arg3[%c0_128, %c1_129, %c0_130, %c0_131] : memref<1x3x2x128xf32, #tpu.memory_space<vmem>>, vector<1x1x2x128xf32>
    %490 = vector.shape_cast %489 : vector<1x1x2x128xf32> to vector<2x128xf32>
    %491 = vector.shape_cast %480 : vector<2x128xf32> to vector<1x1x2x128xf32>
    tpu.vector_store %arg3[%c0_128, %c1_129, %c0_130, %c0_131], %491 {strides = array<i32>} : memref<1x3x2x128xf32, #tpu.memory_space<vmem>>, vector<1x1x2x128xf32>,
    %c0_132 = arith.constant 0 : index
    %c2_133 = arith.constant 2 : index
    %c0_134 = arith.constant 0 : index
    %c0_135 = arith.constant 0 : index
    %492 = vector.load %arg3[%c0_132, %c2_133, %c0_134, %c0_135] : memref<1x3x2x128xf32, #tpu.memory_space<vmem>>, vector<1x1x2x128xf32>
    %493 = vector.shape_cast %492 : vector<1x1x2x128xf32> to vector<2x128xf32>
    %494 = vector.shape_cast %485 : vector<2x128xf32> to vector<1x1x2x128xf32>
    tpu.vector_store %arg3[%c0_132, %c2_133, %c0_134, %c0_135], %494 {strides = array<i32>} : memref<1x3x2x128xf32, #tpu.memory_space<vmem>>, vector<1x1x2x128xf32>,
    return
  }
  func.func @transform_0(%arg0: i32) -> i32 {
    %c0_i32 = arith.constant 0 : i32
    %c0_i32_0 = arith.constant 0 : i32
    return %c0_i32 : i32
  }
  func.func @transform_1(%arg0: i32) -> (i32, i32, i32, i32) {
    %c0_i32 = arith.constant 0 : i32
    %c0_i32_0 = arith.constant 0 : i32
    %c0_i32_1 = arith.constant 0 : i32
    %c0_i32_2 = arith.constant 0 : i32
    return %arg0, %c0_i32, %c0_i32_0, %c0_i32_1 : i32, i32, i32, i32
  }
  func.func @transform_2(%arg0: i32) -> (i32, i32, i32, i32) {
    %c0_i32 = arith.constant 0 : i32
    %c0_i32_0 = arith.constant 0 : i32
    %c0_i32_1 = arith.constant 0 : i32
    %c0_i32_2 = arith.constant 0 : i32
    return %arg0, %c0_i32, %c0_i32_0, %c0_i32_1 : i32, i32, i32, i32
  }
}

</mosaic_0001>

<bundles_post_ra>
// kernel: lbm_gram_schmidt_forward.1
= control target key start
LH: loop header
LB: loop body
LE: loop exit
PB: predicated region body
PF: predicated region fallthrough
CT: control target
= control target key end

     0   :  { %7 = vsyncpa [#allocation3], 0  ;;  %s757_s9 = smov 0   ;;  %s1006_s0 = inlined_call_operand.vmem [shape: f32[7], index: 0, kind: input, shape index: {}]   ;;  %s1007_s1 = inlined_call_operand.vmem [shape: f32[2,9,2,128], index: 1, kind: input, shape index: {}]   ;;  %s1008_s2 = inlined_call_operand.vmem [shape: f32[2,3,2,128], index: 2, kind: output, shape index: {}]  }
   0x1 LB: > { %s654_s10 = sadd.s32 4294967295, %s733_s9   ;;  %p656_p0 = scmp.ge.s32.totalorder %s733_s9, 1  ;;  %s733_s9 = sphi %s757_s9, %s13_s9  }
   0x2   : > { %p91_p1 = scmp.lt.s32.totalorder %s733_s9, 3  ;;  %s103_s13 = sshll.u32 %s1006_s0, 4  ;;  %s104_s13 = int_to_ptr.vmem [resolvable:$true] %s103_s13 }
   0x3   : > { %p691_p3 = scmp.eq.s32.totalorder %s654_s10, 0  ;;  %s735_s14 = smov [#allocation2]  }
   0x4   : > { %p92_p2 = pnand %p656_p0, %p91_p1 }
   0x6   : > { %p687_p4 = pneg %p92_p2  ;;  %124 = sbr.rel (%p92_p2) target bundleno = 535 (0x217), region = 28 }
   0x8   : > { %p688_p5 = pnand %p691_p3, %p687_p4 }
   0xa   : > { %690 = dma.vmem_to_smem (!%p688_p5), %s104_s13, 16, %s735_s14, [#allocation3]  }
   0xb   : > { %728 = dma.done.wait (%p691_p3), [#allocation3], 16  }
   0xc   : > { %730 = vsyncadd (%p691_p3), [#allocation3], 4294967280 }
   0xd   : > { %131 = sfence }
   0xe   : > { %p148_p6 = scmp.lt.s32.totalorder %s654_s10, 1  ;;  %s736_s19 = smov 15   ;;  %v215_v8 = vlaneseq  ;;  %vm250_vm2 = vcmask 1040384  }
   0xf   : > { %s737_s20 = smov 113   ;;  %s738_s21 = smov 127  }
  0x10   : > { %s1014_s10 = smov (!%p148_p6, %s654_s10), 1  ;;  %s739_s22 = smov 1   ;;  %v798_v9 = vand.u32 127, %v215_v8 }
  0x11   : > { %s681_s15 = smul.u32 18, %s1014_s10  ;;  %s740_s23 = smov 16  }
  0x12   : > { %s741_s24 = smov 112   ;;  %v221_v11 = vand.u32 15, %v798_v9  ;;  %s812_s25 = sld [smem:[#allocation2]]  ;;  %vm231_vm3 = vcmp.lt.s32.totalorder %v798_v9, 16  ;;  %vm232_vm4 = vcmp.ge.s32.totalorder %v798_v9, 112 }
  0x13   : > { %s774_s18 = scalar_lea.vmem %s1007_s1, %s681_s15  ;;  %s814_s26 = sld [smem:[#allocation2 + $0x2]] }
  0x14   : > { %v668_v0 = vld [vmem:[%s774_s18 + $0xc] sm:$0x3]  ;;  %v667_v1 = vld [vmem:[%s774_s18 + $0xa] sm:$0x3]  ;;  %v669_v2 = vld [vmem:[%s774_s18 + $0xe] sm:$0x3] }
  0x15   : > { %292 = vrot.lane.b32.xlu1 %v668_v0, %s736_s19  ;;  %273 = vrot.lane.b32.xlu0 %v667_v1, %s737_s20  ;;  %v670_v3 = vld [vmem:[%s774_s18 + $0x10] sm:$0x3]  ;;  %v663_v4 = vld [vmem:[%s774_s18 + $0x2] sm:$0x3]  ;;  %vm801_vm0 = vcmp.eq.s32.totalorder %v221_v11, 15  ;;  %vm808_vm1 = vcmp.eq.s32.totalorder %v221_v11, 0 }
  0x16   : > { %311 = vrot.lane.b32.xlu2 %v669_v2, %s736_s19  ;;  %v665_v5 = vld [vmem:[%s774_s18 + $0x6] sm:$0x3]  ;;  %v664_v6 = vld [vmem:[%s774_s18 + $0x4] sm:$0x3]  ;;  %v666_v7 = vld [vmem:[%s774_s18 + $0x8] sm:$0x3] }
  0x17   : > { %s822_s27 = sld [smem:[#allocation2 + $0x1]]  ;;  %v838_v31 = vld [vmem:[%s774_s18] sm:$0x3] }
  0x18   : > { %s824_s28 = sld [smem:[#allocation2 + $0x3]]  ;;  %s182_s29 = smul.f32 -0.18518518, %s812_s25 }
  0x19   : > { %s184_s30 = smul.f32 0.18518518, %s814_s26  ;;  %s859_s8 = sld [smem:[#allocation2 + $0x4]] }
  0x1a   : > { %s183_s3 = sadd.f32 0.18518518, %s182_s29  ;;  %s202_s11 = smul.f32 0.09259259, %s812_s25 }
  0x1b   : > { %s204_s13 = smul.f32 0.046296295, %s814_s26  ;;  %s880_s16 = sld [smem:[#allocation2 + $0x6]] }
  0x1c   : > { %s831_s4 = sadd.f32 %s184_s30, %s183_s3  ;;  %s189_s17 = smul.f32 -0.046296295, %s812_s25 }
  0x1d   : > { %295 = vrot.lane.b32.xlu1 %v668_v0, %s738_s21  ;;  %276 = vrot.lane.b32.xlu0 %v667_v1, %s739_s22  ;;  %s186_s5 = smul.f32 -0.18518518, %s822_s27  ;;  %s203_s12 = sadd.f32 0.18518518, %s202_s11 }
  0x1e   : > { %314 = vrot.lane.b32.xlu2 %v669_v2, %s738_s21  ;;  %s187_s6 = smul.f32 -0.18518518, %s824_s28  ;;  %s190_s25 = sadd.f32 0.18518518, %s189_s17 }
  0x1f   : > { %s212_s14 = smul.f32 -0.1388889, %s859_s8  ;;  %s205_s18 = sadd.f32 %s204_s13, %s203_s12 }
  0x20   : > { %s835_s7 = sadd.f32 %s187_s6, %s186_s5  ;;  %s206_s15 = smul.f32 0.1388889, %s859_s8 }
  0x21   : > { %s208_s29 = smul.f32 0.09259259, %s822_s27  ;;  %s887_s30 = sadd.f32 -0.2777778, %s212_s14 }
  0x22   : > { %s891_s3 = sadd.f32 0.2777778, %s206_s15  ;;  %s209_s5 = smul.f32 -0.046296295, %s824_s28 }
  0x23   : > { %s191_s6 = smul.f32 -0.09259259, %s814_s26  ;;  %s924_s17 = sld [smem:[#allocation2 + $0x5]] }
  0x24   : > { %s210_s11 = sadd.f32 %s209_s5, %s208_s29  ;;  %s214_s12 = smul.f32 -0.41666666, %s880_s16 }
  0x25   : > { %333 = vrot.lane.b32.xlu1 %v670_v3, %s739_s22  ;;  %330 = vrot.lane.b32.xlu0 %v670_v3, %s737_s20  ;;  %s192_s26 = sadd.f32 %s191_s6, %s190_s25  ;;  %s211_s13 = smul.f32 0.41666666, %s880_s16 }
  0x26   : > { %242 = vrot.lane.b32.xlu2 %v664_v6, %s740_s23  ;;  %s193_s14 = smul.f32 -0.2777778, %s859_s8 }
  0x27   : > { %s195_s15 = smul.f32 -0.046296295, %s822_s27 }
  0x28   : > { %s196_s16 = smul.f32 0.09259259, %s824_s28 }
  0x29   : > { %s200_s28 = smul.f32 0.2777778, %s859_s8 }
  0x2a   : > { %s197_s27 = sadd.f32 %s196_s16, %s195_s15  ;;  %s198_s8 = smul.f32 0.41666666, %s924_s17 }
  0x2d   : > { %237 = vrot.lane.b32.xlu1 %v663_v4, %s739_s22  ;;  %234 = vrot.lane.b32.xlu0 %v663_v4, %s737_s20 }
  0x2e   : > { %262 = vrot.lane.b32.xlu2 %v666_v7, %s741_s24 }
  0x35   : > { %257 = vrot.lane.b32.xlu1 %v665_v5, %s738_s21  ;;  %254 = vrot.lane.b32.xlu0 %v665_v5, %s736_s19 }
  0x70   : > { %v312_v10 = vpop.permute.xlu2 %311 }
  0x78   : > { %v315_v13 = vpop.permute.xlu2 %314 }
  0x79   : > { %v317_v14 = vsel %vm801_vm0, %v312_v10, %v315_v13 }
  0x7a   : > { %319 = vrot.lane.b32.xlu1 %v317_v14, %s741_s24  ;;  %v413_v14 = vstv %s205_s18  ;;  %s926_s18 = sadd.f32 0.2777778, %s193_s14 }
  0x80   : > { %v243_v25 = vpop.permute.xlu2 %242 }
  0x81   : > { %v246_v29 = vrot.slane %v243_v25, 1  ;;  %v248_v30 = vrot.slane %v243_v25, 7 }
  0x83   : > { %v251_v33 = vsel %vm250_vm2, %v246_v29, %v248_v30 }
  0x84   : > { %v850_v36 = vsel %vm231_vm3, %v251_v33, %v243_v25 }
  0x87   : > { %v293_v15 = vpop.permute.xlu1 %292  ;;  %v274_v16 = vpop.permute.xlu0 %273 }
  0x88   : > { %v263_v28 = vpop.permute.xlu2 %262 }
  0x89   : > { %v266_v37 = vrot.slane %v263_v28, 1  ;;  %v268_v38 = vrot.slane %v263_v28, 7 }
  0x8b   : > { %v270_v43 = vsel %vm250_vm2, %v266_v37, %v268_v38  ;;  %v421_v37 = vstv %s210_s11 }
  0x8c   : > { %v864_v48 = vsel %vm232_vm4, %v270_v43, %v263_v28 }
  0x8d   : > { %v361_v53 = vsub.f32 %v850_v36, %v864_v48 }
  0x8f   : > { %v296_v18 = vpop.permute.xlu1 %295  ;;  %v277_v19 = vpop.permute.xlu0 %276 }
  0x90   : > { %v298_v20 = vsel %vm801_vm0, %v293_v15, %v296_v18  ;;  %v279_v21 = vsel %vm808_vm1, %v274_v16, %v277_v19 }
  0x91   : > { %300 = vrot.lane.b32.xlu0 %v298_v20, %s740_s23  ;;  %281 = vrot.lane.b32.xlu2 %v279_v21, %s740_s23  ;;  %v429_v20 = vstv %s887_s30 }
  0x97   : > { %v334_v22 = vpop.permute.xlu1 %333  ;;  %v331_v23 = vpop.permute.xlu0 %330 }
  0x98   : > { %v336_v24 = vsel %vm808_vm1, %v331_v23, %v334_v22  ;;  %v416_v22 = vstv %s891_s3 }
  0x99   : > { %338 = vrot.lane.b32.xlu2 %v336_v24, %s741_s24 }
  0x9f   : > { %v238_v26 = vpop.permute.xlu1 %237  ;;  %v235_v27 = vpop.permute.xlu0 %234 }
  0xa0   : > { %v842_v32 = vsel %vm808_vm1, %v235_v27, %v238_v26 }
  0xa1   : > { %v348_v35 = vadd.f32 %v842_v32, %v838_v31 }
  0xa3   : > { %v349_v41 = vadd.f32 %v348_v35, %v850_v36 }
  0xa7   : > { %v258_v34 = vpop.permute.xlu1 %257  ;;  %v255_v39 = vpop.permute.xlu0 %254 }
  0xa8   : > { %v855_v42 = vsel %vm801_vm0, %v255_v39, %v258_v34 }
  0xa9   : > { %v350_v46 = vadd.f32 %v349_v41, %v855_v42  ;;  %v356_v55 = vsub.f32 %v842_v32, %v855_v42  ;;  %v434_v41 = vstv %s214_s12 }
  0xab   : > { %v351_v54 = vadd.f32 %v350_v46, %v864_v48 }
  0xeb   : > { %v282_v40 = vpop.permute.xlu2 %281 }
  0xec   : > { %v285_v44 = vrot.slane %v282_v40, 1  ;;  %v287_v45 = vrot.slane %v282_v40, 7  ;;  %v320_v47 = vpop.permute.xlu1 %319 }
  0xed   : > { %v323_v50 = vrot.slane %v320_v47, 1  ;;  %v325_v51 = vrot.slane %v320_v47, 7 }
  0xee   : > { %v289_v49 = vsel %vm250_vm2, %v285_v44, %v287_v45  ;;  %v379_v44 = vstv %s192_s26  ;;  %v424_v45 = vstv %s211_s13 }
  0xef   : > { %v290_v56 = vsel %vm231_vm3, %v289_v49, %v282_v40  ;;  %v327_v62 = vsel %vm250_vm2, %v323_v50, %v325_v51 }
  0xf0   : > { %v362_v63 = vadd.f32 %v361_v53, %v290_v56  ;;  %v352_v0 = vadd.f32 %v351_v54, %v290_v56  ;;  %v357_v1 = vadd.f32 %v356_v55, %v290_v56  ;;  %v328_v8 = vsel %vm232_vm4, %v327_v62, %v320_v47 }
  0xf1   : > { %v412_v21 = vmul.f32 -0.6666667, %v290_v56  ;;  %v437_v27 = vmul.f32 -0.6666667, %v328_v8 }
  0xf3   : > { %v339_v52 = vpop.permute.xlu2 %338 }
  0xf4   : > { %v342_v60 = vrot.slane %v339_v52, 1  ;;  %v344_v61 = vrot.slane %v339_v52, 7 }
  0xf6   : > { %v346_v7 = vsel %vm250_vm2, %v342_v60, %v344_v61 }
  0xf7   : > { %v347_v15 = vsel %vm232_vm4, %v346_v7, %v339_v52 }
  0xf8   : > { %v444_v51 = vmul.f32 -0.6666667, %v347_v15 }
 0x103   : > { %v301_v57 = vpop.permute.xlu0 %300 }
 0x104   : > { %v304_v58 = vrot.slane %v301_v57, 1  ;;  %v306_v59 = vrot.slane %v301_v57, 7 }
 0x106   : > { %v308_v2 = vsel %vm250_vm2, %v304_v58, %v306_v59  ;;  %v372_v58 = vstv %s831_s4  ;;  %v375_v59 = vstv %s835_s7  ;;  %s199_s4 = smul.f32 -0.41666666, %s924_s17  ;;  %s939_s7 = sadd.f32 -0.2777778, %s200_s28 }
 0x107   : > { %v309_v3 = vsel %vm231_vm3, %v308_v2, %v301_v57  ;;  %v382_v2 = vstv %s926_s18 }
 0x108   : > { %v353_v4 = vadd.f32 %v352_v0, %v309_v3  ;;  %v358_v5 = vsub.f32 %v357_v1, %v309_v3  ;;  %v363_v6 = vadd.f32 %v362_v63, %v309_v3  ;;  %v427_v23 = vmul.f32 -0.6666667, %v309_v3 }
 0x109   : > { %v371_v0 = vmul.f32 -0.6666667, %v838_v31  ;;  %v391_v1 = vmul.f32 -0.6666667, %v850_v36 }
 0x10a   : > { %v354_v10 = vadd.f32 %v353_v4, %v328_v8  ;;  %v359_v11 = vsub.f32 %v358_v5, %v328_v8  ;;  %v364_v13 = vsub.f32 %v363_v6, %v328_v8  ;;  %v385_v8 = vstv %s197_s27 }
 0x10c   : > { %v355_v16 = vadd.f32 %v354_v10, %v347_v15  ;;  %v897_v18 = vadd.f32 %v359_v11, %v347_v15  ;;  %v899_v19 = vsub.f32 %v364_v13, %v347_v15 }
 0x10e   : > { %v414_v24 = vmul.f32 %v413_v14, %v355_v16  ;;  %v906_v25 = vmul.f32 %v897_v18, %v897_v18  ;;  %v910_v26 = vmul.f32 %v899_v19, %v899_v19  ;;  %v430_v28 = vmul.f32 %v429_v20, %v897_v18 }
 0x10f   : > { %v417_v34 = vmul.f32 %v416_v22, %v897_v18  ;;  %v370_v35 = vmul.f32 %v899_v19, %v897_v18  ;;  %v419_v39 = vmul.f32 %v416_v22, %v899_v19  ;;  %v440_v56 = vmul.f32 %v429_v20, %v899_v19 }
 0x110   : > { %v368_v29 = vadd.f32 %v910_v26, %v906_v25  ;;  %v428_v30 = vadd.f32 %v427_v23, %v414_v24  ;;  %v415_v33 = vadd.f32 %v414_v24, %v412_v21  ;;  %v438_v38 = vadd.f32 %v437_v27, %v414_v24 }
 0x111   : > { %v435_v52 = vmul.f32 %v434_v41, %v370_v35  ;;  %v425_v55 = vmul.f32 %v424_v45, %v370_v35  ;;  %v380_v57 = vmul.f32 %v379_v44, %v355_v16  ;;  %v445_v60 = vadd.f32 %v444_v51, %v414_v24 }
 0x112   : > { %v431_v40 = vadd.f32 %v430_v28, %v428_v30  ;;  %v418_v43 = vadd.f32 %v417_v34, %v415_v33  ;;  %v422_v46 = vmul.f32 %v421_v37, %v368_v29  ;;  %v439_v50 = vadd.f32 %v438_v38, %v430_v28 }
 0x113   : > { %v376_v3 = vmul.f32 %v375_v59, %v368_v29  ;;  %v373_v4 = vmul.f32 %v372_v58, %v355_v16  ;;  %v446_v6 = vadd.f32 %v445_v60, %v417_v34  ;;  %v392_v7 = vadd.f32 %v391_v1, %v380_v57 }
 0x114   : > { %v432_v47 = vadd.f32 %v431_v40, %v419_v39  ;;  %v420_v49 = vadd.f32 %v419_v39, %v418_v43  ;;  %v441_v63 = vadd.f32 %v440_v56, %v439_v50  ;;  %v393_v31 = vmul.f32 %v382_v2, %v899_v19 }
 0x115   : > { %v374_v10 = vadd.f32 %v373_v4, %v371_v0  ;;  %v447_v13 = vadd.f32 %v446_v6, %v440_v56  ;;  %v386_v14 = vmul.f32 %v385_v8, %v368_v29  ;;  %v406_v16 = vmul.f32 -0.6666667, %v864_v48 }
 0x116   : > { %v433_v53 = vadd.f32 %v432_v47, %v422_v46  ;;  %v423_v54 = vadd.f32 %v422_v46, %v420_v49  ;;  %v442_v5 = vadd.f32 %v441_v63, %v422_v46  ;;  %v394_v15 = vadd.f32 %v393_v31, %v392_v7 }
 0x117   : > { %v941_v36 = vadd.f32 %v376_v3, %v374_v10  ;;  %v378_v20 = vmul.f32 -0.6666667, %v842_v32  ;;  %v369_v21 = vsub.f32 %v906_v25, %v910_v26  ;;  %v396_v22 = vstv %s199_s4 }
 0x118   : > { %v436_v61 = vadd.f32 %v435_v52, %v433_v53  ;;  %v426_v62 = vadd.f32 %v425_v55, %v423_v54  ;;  %v443_v11 = vadd.f32 %v442_v5, %v425_v55  ;;  %v401_v23 = vstv %s939_s7 }
 0x119   : > { %v448_v24 = vadd.f32 %v447_v13, %v422_v46  ;;  %v395_v27 = vadd.f32 %v394_v15, %v386_v14  ;;  %v407_v28 = vadd.f32 %v406_v16, %v380_v57  ;;  %v381_v29 = vadd.f32 %v380_v57, %v378_v20 }
 0x11a   : > { %508 = vrot.lane.b32.xlu2 %v436_v61, %s736_s19  ;;  %492 = vrot.lane.b32.xlu1 %v426_v62, %s739_s22  ;;  %v397_v30 = vmul.f32 %v396_v22, %v369_v21  ;;  %v408_v48 = vmul.f32 %v401_v23, %v899_v19  ;;  %v383_v32 = vmul.f32 %v382_v2, %v897_v18  ;;  %v399_v25 = vmul.f32 -0.6666667, %v855_v42 }
 0x11b   : > { %489 = vrot.lane.b32.xlu0 %v426_v62, %s737_s20  ;;  %v449_v33 = vadd.f32 %v448_v24, %v435_v52  ;;  %v388_v26 = vstv %s198_s8  ;;  %v402_v41 = vmul.f32 %v401_v23, %v897_v18 }
 0x11c   : > { %v398_v34 = vadd.f32 %v397_v30, %v395_v27  ;;  %v409_v35 = vadd.f32 %v408_v48, %v407_v28  ;;  %v384_v37 = vadd.f32 %v383_v32, %v381_v29  ;;  %v400_v40 = vadd.f32 %v399_v25, %v380_v57 }
 0x11d   : > { %v389_v19 = vmul.f32 %v388_v26, %v369_v21 }
 0x11e   : > { %v410_v38 = vadd.f32 %v409_v35, %v386_v14  ;;  %v387_v39 = vadd.f32 %v386_v14, %v384_v37  ;;  %v403_v45 = vadd.f32 %v402_v41, %v400_v40 }
 0x120   : > { %v411_v43 = vadd.f32 %v410_v38, %v397_v30  ;;  %v390_v44 = vadd.f32 %v389_v19, %v387_v39  ;;  %v404_v42 = vadd.f32 %v403_v45, %v386_v14 }
 0x122   : > { %530 = vrot.lane.b32.xlu2 %v443_v11, %s738_s21  ;;  %527 = vrot.lane.b32.xlu1 %v443_v11, %s736_s19  ;;  %v405_v46 = vadd.f32 %v404_v42, %v389_v19 }
 0x123   : > { %511 = vrot.lane.b32.xlu0 %v436_v61, %s738_s21 }
 0x12a   : > { %549 = vrot.lane.b32.xlu1 %v449_v33, %s739_s22  ;;  %459 = vrot.lane.b32.xlu2 %v398_v34, %s740_s23 }
 0x12b   : > { %546 = vrot.lane.b32.xlu0 %v449_v33, %s737_s20 }
 0x132   : > { %478 = vrot.lane.b32.xlu2 %v411_v43, %s741_s24  ;;  %454 = vrot.lane.b32.xlu1 %v390_v44, %s739_s22 }
 0x133   : > { %451 = vrot.lane.b32.xlu0 %v390_v44, %s737_s20 }
 0x13a   : > { %473 = vrot.lane.b32.xlu1 %v405_v46, %s738_s21 }
 0x13b   : > { %470 = vrot.lane.b32.xlu0 %v405_v46, %s736_s19  ;;  %s682_s19 = smul.u32 6, %s1014_s10 }
 0x13d   : > { %s157_s10 = scalar_lea.vmem %s1008_s2, %s682_s19 }
 0x174   : > { %v509_v47 = vpop.permute.xlu2 %508 }
 0x17c   : > { %v531_v51 = vpop.permute.xlu2 %530 }
 0x184   : > { %v460_v59 = vpop.permute.xlu2 %459 }
 0x185   : > { %v463_v63 = vrot.slane %v460_v59, 1  ;;  %v465_v0 = vrot.slane %v460_v59, 7 }
 0x187   : > { %v467_v5 = vsel %vm250_vm2, %v463_v63, %v465_v0 }
 0x188   : > { %v468_v11 = vsel %vm231_vm3, %v467_v5, %v460_v59 }
 0x18c   : > { %v493_v49 = vpop.permute.xlu1 %492  ;;  %v479_v62 = vpop.permute.xlu2 %478 }
 0x18d   : > { %v490_v50 = vpop.permute.xlu0 %489  ;;  %v482_v2 = vrot.slane %v479_v62, 1  ;;  %v484_v3 = vrot.slane %v479_v62, 7 }
 0x18e   : > { %v495_v18 = vsel %vm808_vm1, %v490_v50, %v493_v49 }
 0x18f   : > { %497 = vrot.lane.b32.xlu2 %v495_v18, %s740_s23  ;;  %v486_v13 = vsel %vm250_vm2, %v482_v2, %v484_v3 }
 0x190   : > { %v487_v15 = vsel %vm232_vm4, %v486_v13, %v479_v62 }
 0x191   : > { %v577_v21 = vsub.f32 %v468_v11, %v487_v15 }
 0x194   : > { %v528_v52 = vpop.permute.xlu1 %527 }
 0x195   : > { %v512_v53 = vpop.permute.xlu0 %511  ;;  %v533_v54 = vsel %vm801_vm0, %v528_v52, %v531_v51 }
 0x196   : > { %535 = vrot.lane.b32.xlu1 %v533_v54, %s741_s24  ;;  %v514_v55 = vsel %vm801_vm0, %v509_v47, %v512_v53 }
 0x197   : > { %516 = vrot.lane.b32.xlu0 %v514_v55, %s740_s23 }
 0x19c   : > { %v550_v56 = vpop.permute.xlu1 %549 }
 0x19d   : > { %v547_v57 = vpop.permute.xlu0 %546 }
 0x19e   : > { %v552_v58 = vsel %vm808_vm1, %v547_v57, %v550_v56 }
 0x19f   : > { %554 = vrot.lane.b32.xlu2 %v552_v58, %s741_s24 }
 0x1a4   : > { %v455_v60 = vpop.permute.xlu1 %454 }
 0x1a5   : > { %v452_v61 = vpop.permute.xlu0 %451 }
 0x1a6   : > { %v457_v1 = vsel %vm808_vm1, %v452_v61, %v455_v60 }
 0x1a7   : > { %v564_v6 = vadd.f32 %v457_v1, %v941_v36 }
 0x1a9   : > { %v565_v14 = vadd.f32 %v564_v6, %v468_v11 }
 0x1ac   : > { %v474_v7 = vpop.permute.xlu1 %473 }
 0x1ad   : > { %v471_v8 = vpop.permute.xlu0 %470 }
 0x1ae   : > { %v476_v17 = vsel %vm801_vm0, %v471_v8, %v474_v7 }
 0x1af   : > { %v566_v16 = vadd.f32 %v565_v14, %v476_v17  ;;  %v572_v27 = vsub.f32 %v457_v1, %v476_v17 }
 0x1b1   : > { %v567_v24 = vadd.f32 %v566_v16, %v487_v15 }
 0x1e9   : > { %v498_v4 = vpop.permute.xlu2 %497 }
 0x1ea   : > { %v501_v10 = vrot.slane %v498_v4, 1  ;;  %v503_v31 = vrot.slane %v498_v4, 7 }
 0x1ec   : > { %v505_v20 = vsel %vm250_vm2, %v501_v10, %v503_v31 }
 0x1ed   : > { %v506_v22 = vsel %vm231_vm3, %v505_v20, %v498_v4 }
 0x1ee   : > { %v568_v34 = vadd.f32 %v567_v24, %v506_v22  ;;  %v573_v35 = vadd.f32 %v572_v27, %v506_v22  ;;  %v578_v37 = vadd.f32 %v577_v21, %v506_v22 }
 0x1f9   : > { %v555_v36 = vpop.permute.xlu2 %554 }
 0x1fa   : > { %v558_v30 = vrot.slane %v555_v36, 1  ;;  %v560_v48 = vrot.slane %v555_v36, 7 }
 0x1fc   : > { %v562_v39 = vsel %vm250_vm2, %v558_v30, %v560_v48 }
 0x1fd   : > { %v563_v46 = vsel %vm232_vm4, %v562_v39, %v555_v36 }
 0x208   : > { %v536_v23 = vpop.permute.xlu1 %535 }
 0x209   : > { %v539_v28 = vrot.slane %v536_v23, 1  ;;  %v541_v29 = vrot.slane %v536_v23, 7  ;;  %v517_v12 = vpop.permute.xlu0 %516 }
 0x20a   : > { %v520_v32 = vrot.slane %v517_v12, 1  ;;  %v522_v33 = vrot.slane %v517_v12, 7 }
 0x20b   : > { %v543_v25 = vsel %vm250_vm2, %v539_v28, %v541_v29 }
 0x20c   : > { %v524_v26 = vsel %vm250_vm2, %v520_v32, %v522_v33  ;;  %v544_v43 = vsel %vm232_vm4, %v543_v25, %v536_v23 }
 0x20d   : > { %v525_v38 = vsel %vm231_vm3, %v524_v26, %v517_v12 }
 0x20e   : > { %v569_v40 = vadd.f32 %v568_v34, %v525_v38  ;;  %v574_v19 = vsub.f32 %v573_v35, %v525_v38  ;;  %v579_v41 = vadd.f32 %v578_v37, %v525_v38 }
 0x210   : > { %v570_v44 = vadd.f32 %v569_v40, %v544_v43  ;;  %v575_v45 = vsub.f32 %v574_v19, %v544_v43  ;;  %v580_v42 = vsub.f32 %v579_v41, %v544_v43 }
 0x212   : > { %v571_v47 = vadd.f32 %v570_v44, %v563_v46  ;;  %v576_v49 = vadd.f32 %v575_v45, %v563_v46  ;;  %v581_v50 = vsub.f32 %v580_v42, %v563_v46 }
 0x214   : > { %582 = vst [vmem:[%s157_s10] sm:$0x3] %v571_v47 }
 0x215   : > { %677 = vst [vmem:[%s157_s10 + $0x2] sm:$0x3] %v576_v49 }
 0x216   : > { %678 = vst [vmem:[%s157_s10 + $0x4] sm:$0x3] %v581_v50 }
 0x217 PF: > { %s13_s9 = sadd.s32 1, %s733_s9  }
 0x218   : > { %p10_p7 = scmp.ge.s32.totalorder %s13_s9, 4  }
 0x21a   :  { %12 = sbr.rel (!%p10_p7) target bundleno = 1 (0x1), region = 73 }
 0x21f   :  { %608 = vsyncpa [#allocation3], 1 }
 0x220   :  { %610 = vsyncpa [#allocation3 + $0x1], 1 }

</bundles_post_ra>
